<compile_context>
chip_gen: v5e
topology: v5e:2x2
jax: 0.10.0
libtpu: 0.0.40
codegen_flags: <defaults>
</compile_context>

<pallas_src>
import functools

import numpy as np
import jax
import jax.numpy as jnp
from jax import lax
from jax.experimental import pallas as pl
from jax.experimental.pallas import tpu as pltpu


def _shift_lanes(x, s):
    """y[:, p] = x[:, p + s] for p in [0, P); zero where p + s is out of range."""
    if s == 0:
        return x
    rows, p_total = x.shape
    if abs(s) >= p_total:
        return jnp.zeros_like(x)
    if s > 0:
        pad = jnp.zeros((rows, s), x.dtype)
        return jnp.concatenate([x[:, s:], pad], axis=1)
    pad = jnp.zeros((rows, -s), x.dtype)
    return jnp.concatenate([pad, x[:, :p_total + s]], axis=1)


def _cnn_kernel(*refs, layer_dims, pool, pad, neg_slope):
    """Fused conv-stack forward for one block of `nb` images.

    refs layout: x_ref, (w, b, cmask, sel) per layer, o_ref
      x_ref : (nb, C0, H0*W0)       NCHW input, spatial flattened into lanes
      w     : (K, Cout, K*Cin)      row taps: w[kh, o, kw*Cin + ci]
      b     : (Cout, 1)
      cmask : (K, H*W)              0/1 column-edge validity for each kw offset
      sel   : (H*W, Ho*Wo)          0/1 pool-window selection (compaction)
      o_ref : (nb, C_f, Ho_f*Wo_f)  NCHW output, spatial flattened
    """
    x_ref = refs[0]
    o_ref = refs[-1]
    aux = refs[1:-1]
    nb = x_ref.shape[0]

    acts = [x_ref[n].astype(jnp.float32) for n in range(nb)]  # each (Cin, P)

    for li, (H, W, Cin, K, Cout) in enumerate(layer_dims):
        P = H * W
        w_rows = aux[4 * li][...].astype(jnp.float32)      # (K, Cout, K*Cin)
        bias = aux[4 * li + 1][...].astype(jnp.float32)    # (Cout, 1)
        cmask = aux[4 * li + 2][...]                       # (K, P)
        sel = aux[4 * li + 3][...]                         # (P, Po)

        new_acts = []
        for n in range(nb):
            x = acts[n]                                    # (Cin, P)

            # Column taps: lane shift by dw, zero the row-edge wraparound
            # columns, stack along the contraction axis (sublanes).
            cols = []
            for kw in range(K):
                dw = kw - pad
                t = _shift_lanes(x, dw)
                if dw != 0:
                    t = t * cmask[kw:kw + 1, :]
                cols.append(t)
            xcat = jnp.concatenate(cols, axis=0)           # (K*Cin, P)

            # Conv = K row-shifted matmuls accumulated in f32 on the MXU.
            # Zero-fill of the flat row shift reproduces the top/bottom pad.
            y = jnp.zeros((Cout, P), jnp.float32)
            for kh in range(K):
                dh = kh - pad
                tap = _shift_lanes(xcat, dh * W)
                y = y + jnp.dot(w_rows[kh], tap,
                                preferred_element_type=jnp.float32)
            y = y + bias

            # LeakyReLU (negative_slope); Dropout is identity in eval mode.
            y = jnp.where(y >= 0.0, y, neg_slope * y)

            # MaxPool(pool), floor mode: window max via lane shifts, then one
            # compaction matmul against a constant 0/1 selection matrix.
            m = y
            for d in range(1, pool):
                m = jnp.maximum(m, _shift_lanes(y, d))
            mm = m
            for d in range(1, pool):
                mm = jnp.maximum(mm, _shift_lanes(m, d * W))
            new_acts.append(jnp.dot(mm, sel,
                                    preferred_element_type=jnp.float32))
        acts = new_acts

    for n in range(nb):
        o_ref[n] = acts[n].astype(o_ref.dtype)


def _layer_aux(H, W, K, pad, pool):
    """Host-side constants: column-edge masks and pool/crop selection matrix."""
    P = H * W
    Hc = H + 2 * pad - K + 1
    Wc = W + 2 * pad - K + 1
    Ho, Wo = Hc // pool, Wc // pool
    assert Ho >= 1 and Wo >= 1, "spatial dims too small for this pooling"
    Po = Ho * Wo
    j = np.arange(P) % W
    cmask = np.zeros((K, P), np.float32)
    for kw in range(K):
        dw = kw - pad
        cmask[kw] = ((j + dw >= 0) & (j + dw < W)).astype(np.float32)
    q = np.arange(Po)
    src = (q // Wo) * (pool * W) + (q % Wo) * pool   # flat (H,W) index kept by pool
    S = np.zeros((P, Po), np.float32)
    S[src, q] = 1.0
    return cmask, S, (Ho, Wo)


def cnn_forward(x_nchw, params, pool, *, pad=1, neg_slope=0.01,
                batch_block=None):
    """Full CNN.forward: first conv block + num_conv_layers ConvBlocks, fused."""
    N, Cin, H, W = x_nchw.shape
    x_flat = x_nchw.reshape(N, Cin, H * W)           # NCHW, spatial flat in lanes

    layer_dims = []
    kern_inputs = []
    in_specs = [None]                                # slot 0 filled in below
    h, w_sp, cin = H, W, Cin
    flops = 0
    aux_bytes = 0
    for (wk, bk) in params:                          # wk: (K, K, Cin, Cout)
        K = wk.shape[0]
        cout = wk.shape[-1]
        # Conv output must fit inside the input grid for the flat-shift scheme.
        assert K >= 2 * pad + 1, "unsupported kernel/padding combination"
        # TODO(synk): layers with K < 2*pad+1 (output larger than input) not supported.
        layer_dims.append((h, w_sp, cin, K, cout))

        w_rows = jnp.transpose(wk, (0, 3, 1, 2)).reshape(K, cout, K * cin)
        b_col = bk.reshape(cout, 1)
        cmask_np, sel_np, (ho, wo) = _layer_aux(h, w_sp, K, pad, pool)
        cmask = jnp.asarray(cmask_np)
        sel = jnp.asarray(sel_np)
        for arr in (w_rows, b_col, cmask, sel):
            kern_inputs.append(arr)
            in_specs.append(
                pl.BlockSpec(arr.shape, lambda g, _nd=arr.ndim: (0,) * _nd))
            aux_bytes += int(arr.size) * 4

        flops += 2 * N * (h * w_sp) * K * K * cin * cout   # conv taps
        flops += 2 * N * cout * (h * w_sp) * (ho * wo)     # pool compaction matmul
        h, w_sp, cin = ho, wo, cout
    Ho_f, Wo_f, C_f = h, w_sp, cin
    Po_f = Ho_f * Wo_f

    if batch_block is None:
        # Keep >= 2 grid steps when possible (feeds both v7x TensorCores);
        # on single-TC v5e/v6e the extra step costs <1us.
        batch_block = N // 2 if (N % 2 == 0 and N >= 2) else N
    nb = batch_block
    assert N % nb == 0, "batch_block must divide the batch size"
    grid = (N // nb,)

    in_specs[0] = pl.BlockSpec((nb, Cin, H * W), lambda g: (g, 0, 0))

    bytes_accessed = aux_bytes * (N // nb)
    bytes_accessed += int(x_flat.size) * 4 + int(N * C_f * Po_f) * 4

    kernel = functools.partial(
        _cnn_kernel, layer_dims=tuple(layer_dims), pool=pool, pad=pad,
        neg_slope=neg_slope)

    out = pl.pallas_call(
        kernel,
        out_shape=jax.ShapeDtypeStruct((N, C_f, Po_f), x_nchw.dtype),
        grid=grid,
        in_specs=in_specs,
        out_specs=pl.BlockSpec((nb, C_f, Po_f), lambda g: (g, 0, 0)),
        compiler_params=pltpu.CompilerParams(
            dimension_semantics=("parallel",)),
        cost_estimate=pl.CostEstimate(
            flops=int(flops), transcendentals=0,
            bytes_accessed=int(bytes_accessed)),
    )(x_flat, *kern_inputs)

    return out.reshape(N, C_f, Ho_f, Wo_f)           # already NCHW-ordered


cnn_forward_jit = jax.jit(
    cnn_forward, static_argnames=("pool", "pad", "neg_slope", "batch_block"))


# -------------------- pure-JAX reference (for correctness check) -----------
def ref_forward(x_nchw, params, pool):
    y = x_nchw
    for (w, b) in params:
        w_oihw = jnp.transpose(w, (3, 2, 0, 1))
        y = jax.lax.conv_general_dilated(
            y, w_oihw, (1, 1), [(1, 1), (1, 1)],
            dimension_numbers=("NCHW", "OIHW", "NCHW"))
        y = y + b[None, :, None, None]
        y = jnp.where(y >= 0, y, 0.01 * y)
        y = jax.lax.reduce_window(
            y, -jnp.inf, jax.lax.max,
            (1, 1, pool, pool), (1, 1, pool, pool), "VALID")
    return y


if __name__ == "__main__":
    # Module config (small, self-consistent):
    N, Cin, H, W = 4, 4, 16, 16
    Cout = 8
    kernel_size = 3          # first conv uses kernel_size with padding=1
    num_conv_layers = 2
    max_pool_size = 2
    # dropout = 0.25 -> identity at inference

    key = jax.random.PRNGKey(0)
    keys = jax.random.split(key, 2 * (num_conv_layers + 1) + 1)

    def init_conv(kw, kb, K, cin, cout):
        # PyTorch Conv2d default init: U(-1/sqrt(fan_in), 1/sqrt(fan_in))
        fan_in = cin * K * K
        bound = 1.0 / (fan_in ** 0.5)
        w = jax.random.uniform(kw, (K, K, cin, cout), jnp.float32, -bound, bound)
        b = jax.random.uniform(kb, (cout,), jnp.float32, -bound, bound)
        return w, b

    params = [init_conv(keys[0], keys[1], kernel_size, Cin, Cout)]
    for i in range(num_conv_layers):
        params.append(init_conv(keys[2 + 2 * i], keys[3 + 2 * i], 3, Cout, Cout))

    x = jax.random.normal(keys[-1], (N, Cin, H, W), jnp.float32)

    out = cnn_forward_jit(x, params, pool=max_pool_size)
    out = jax.block_until_ready(out)

    expected = ref_forward(x, params, max_pool_size)
    assert out.shape == expected.shape, (out.shape, expected.shape)
    max_err = float(jnp.max(jnp.abs(out - expected)))
    assert max_err < 1e-4, max_err

    print("KERNEL_OK")
</pallas_src>

<mosaic_0001>
module attributes {stable_mosaic.version = 11 : i64} {
  func.func @_cnn_kernel(%arg0: i32, %arg1: memref<2x4x256xf32, #tpu.memory_space<vmem>>, %arg2: memref<3x8x12xf32, #tpu.memory_space<vmem>>, %arg3: memref<8x1xf32, #tpu.memory_space<vmem>>, %arg4: memref<3x256xf32, #tpu.memory_space<vmem>>, %arg5: memref<256x64xf32, #tpu.memory_space<vmem>>, %arg6: memref<3x8x24xf32, #tpu.memory_space<vmem>>, %arg7: memref<8x1xf32, #tpu.memory_space<vmem>>, %arg8: memref<3x64xf32, #tpu.memory_space<vmem>>, %arg9: memref<64x16xf32, #tpu.memory_space<vmem>>, %arg10: memref<3x8x24xf32, #tpu.memory_space<vmem>>, %arg11: memref<8x1xf32, #tpu.memory_space<vmem>>, %arg12: memref<3x16xf32, #tpu.memory_space<vmem>>, %arg13: memref<16x4xf32, #tpu.memory_space<vmem>>, %arg14: memref<2x8x4xf32, #tpu.memory_space<vmem>>) attributes {dimension_semantics = [#tpu.dimension_semantics<parallel>], iteration_bounds = array<i64: 2>, scalar_prefetch = 0 : i64, scratch_operands = 0 : i64, tpu.core_type = #tpu.core_type<tc>, window_params = [{transform_indices = @transform_0, window_bounds = array<i64: 2, 4, 256>}, {pipeline_mode = #tpu.pipeline_mode<synchronous>, transform_indices = @transform_1, window_bounds = array<i64: 3, 8, 12>}, {pipeline_mode = #tpu.pipeline_mode<synchronous>, transform_indices = @transform_2, window_bounds = array<i64: 8, 1>}, {pipeline_mode = #tpu.pipeline_mode<synchronous>, transform_indices = @transform_3, window_bounds = array<i64: 3, 256>}, {pipeline_mode = #tpu.pipeline_mode<synchronous>, transform_indices = @transform_4, window_bounds = array<i64: 256, 64>}, {pipeline_mode = #tpu.pipeline_mode<synchronous>, transform_indices = @transform_5, window_bounds = array<i64: 3, 8, 24>}, {pipeline_mode = #tpu.pipeline_mode<synchronous>, transform_indices = @transform_6, window_bounds = array<i64: 8, 1>}, {pipeline_mode = #tpu.pipeline_mode<synchronous>, transform_indices = @transform_7, window_bounds = array<i64: 3, 64>}, {pipeline_mode = #tpu.pipeline_mode<synchronous>, transform_indices = @transform_8, window_bounds = array<i64: 64, 16>}, {pipeline_mode = #tpu.pipeline_mode<synchronous>, transform_indices = @transform_9, window_bounds = array<i64: 3, 8, 24>}, {pipeline_mode = #tpu.pipeline_mode<synchronous>, transform_indices = @transform_10, window_bounds = array<i64: 8, 1>}, {pipeline_mode = #tpu.pipeline_mode<synchronous>, transform_indices = @transform_11, window_bounds = array<i64: 3, 16>}, {pipeline_mode = #tpu.pipeline_mode<synchronous>, transform_indices = @transform_12, window_bounds = array<i64: 16, 4>}, {transform_indices = @transform_13, window_bounds = array<i64: 2, 8, 4>}]} {
    %c0 = arith.constant 0 : index
    %c0_0 = arith.constant 0 : index
    %c0_1 = arith.constant 0 : index
    %0 = vector.load %arg1[%c0, %c0_0, %c0_1] : memref<2x4x256xf32, #tpu.memory_space<vmem>>, vector<1x4x256xf32>
    %1 = vector.shape_cast %0 : vector<1x4x256xf32> to vector<4x256xf32>
    %c1 = arith.constant 1 : index
    %c0_2 = arith.constant 0 : index
    %c0_3 = arith.constant 0 : index
    %2 = vector.load %arg1[%c1, %c0_2, %c0_3] : memref<2x4x256xf32, #tpu.memory_space<vmem>>, vector<1x4x256xf32>
    %3 = vector.shape_cast %2 : vector<1x4x256xf32> to vector<4x256xf32>
    %c0_4 = arith.constant 0 : index
    %c0_5 = arith.constant 0 : index
    %c0_6 = arith.constant 0 : index
    %4 = vector.load %arg2[%c0_4, %c0_5, %c0_6] : memref<3x8x12xf32, #tpu.memory_space<vmem>>, vector<3x8x12xf32>
    %c0_7 = arith.constant 0 : index
    %c0_8 = arith.constant 0 : index
    %5 = vector.load %arg3[%c0_7, %c0_8] : memref<8x1xf32, #tpu.memory_space<vmem>>, vector<8x1xf32>
    %c0_9 = arith.constant 0 : index
    %c0_10 = arith.constant 0 : index
    %6 = vector.load %arg4[%c0_9, %c0_10] : memref<3x256xf32, #tpu.memory_space<vmem>>, vector<3x256xf32>
    %c0_11 = arith.constant 0 : index
    %c0_12 = arith.constant 0 : index
    %7 = vector.load %arg5[%c0_11, %c0_12] : memref<256x64xf32, #tpu.memory_space<vmem>>, vector<256x64xf32>
    %cst = arith.constant 0.000000e+00 : f32
    %8 = vector.broadcast %cst : f32 to vector<4x1xf32>
    %9 = vector.extract_strided_slice %1 {offsets = [0, 0], sizes = [4, 255], strides = [1, 1]} : vector<4x256xf32> to vector<4x255xf32>
    %10 = tpu.concatenate %8, %9 in 1 : vector<4x1xf32>, vector<4x255xf32> -> vector<4x256xf32>
    %11 = vector.extract_strided_slice %6 {offsets = [0, 0], sizes = [1, 256], strides = [1, 1]} : vector<3x256xf32> to vector<1x256xf32>
    %12 = vector.broadcast %11 : vector<1x256xf32> to vector<4x256xf32>
    %13 = arith.mulf %10, %12 : vector<4x256xf32>
    %cst_13 = arith.constant 0.000000e+00 : f32
    %14 = vector.broadcast %cst_13 : f32 to vector<4x1xf32>
    %15 = vector.extract_strided_slice %1 {offsets = [0, 1], sizes = [4, 255], strides = [1, 1]} : vector<4x256xf32> to vector<4x255xf32>
    %16 = tpu.concatenate %15, %14 in 1 : vector<4x255xf32>, vector<4x1xf32> -> vector<4x256xf32>
    %17 = vector.extract_strided_slice %6 {offsets = [2, 0], sizes = [1, 256], strides = [1, 1]} : vector<3x256xf32> to vector<1x256xf32>
    %18 = vector.broadcast %17 : vector<1x256xf32> to vector<4x256xf32>
    %19 = arith.mulf %16, %18 : vector<4x256xf32>
    %20 = tpu.concatenate %13, %1, %19 in 0 : vector<4x256xf32>, vector<4x256xf32>, vector<4x256xf32> -> vector<12x256xf32>
    %cst_14 = arith.constant 0.000000e+00 : f32
    %21 = vector.broadcast %cst_14 : f32 to vector<8x256xf32>
    %cst_15 = arith.constant 0.000000e+00 : f32
    %22 = vector.broadcast %cst_15 : f32 to vector<12x16xf32>
    %23 = vector.extract_strided_slice %20 {offsets = [0, 0], sizes = [12, 240], strides = [1, 1]} : vector<12x256xf32> to vector<12x240xf32>
    %24 = tpu.concatenate %22, %23 in 1 : vector<12x16xf32>, vector<12x240xf32> -> vector<12x256xf32>
    %25 = vector.extract_strided_slice %4 {offsets = [0, 0, 0], sizes = [1, 8, 12], strides = [1, 1, 1]} : vector<3x8x12xf32> to vector<1x8x12xf32>
    %26 = vector.shape_cast %25 : vector<1x8x12xf32> to vector<8x12xf32>
    %cst_16 = arith.constant dense<0.000000e+00> : vector<8x256xf32>
    %27 = tpu.matmul %26, %24, %cst_16 {dimension_numbers = #tpu.dot_dimension_numbers<[1], [0], [0], [1], [0, 0, 1, 1], [], []>} : vector<8x12xf32>, vector<12x256xf32>, vector<8x256xf32> -> vector<8x256xf32>
    %28 = arith.addf %21, %27 : vector<8x256xf32>
    %29 = vector.extract_strided_slice %4 {offsets = [1, 0, 0], sizes = [1, 8, 12], strides = [1, 1, 1]} : vector<3x8x12xf32> to vector<1x8x12xf32>
    %30 = vector.shape_cast %29 : vector<1x8x12xf32> to vector<8x12xf32>
    %cst_17 = arith.constant dense<0.000000e+00> : vector<8x256xf32>
    %31 = tpu.matmul %30, %20, %cst_17 {dimension_numbers = #tpu.dot_dimension_numbers<[1], [0], [0], [1], [0, 0, 1, 1], [], []>} : vector<8x12xf32>, vector<12x256xf32>, vector<8x256xf32> -> vector<8x256xf32>
    %32 = arith.addf %28, %31 : vector<8x256xf32>
    %cst_18 = arith.constant 0.000000e+00 : f32
    %33 = vector.broadcast %cst_18 : f32 to vector<12x16xf32>
    %34 = vector.extract_strided_slice %20 {offsets = [0, 16], sizes = [12, 240], strides = [1, 1]} : vector<12x256xf32> to vector<12x240xf32>
    %35 = tpu.concatenate %34, %33 in 1 : vector<12x240xf32>, vector<12x16xf32> -> vector<12x256xf32>
    %36 = vector.extract_strided_slice %4 {offsets = [2, 0, 0], sizes = [1, 8, 12], strides = [1, 1, 1]} : vector<3x8x12xf32> to vector<1x8x12xf32>
    %37 = vector.shape_cast %36 : vector<1x8x12xf32> to vector<8x12xf32>
    %cst_19 = arith.constant dense<0.000000e+00> : vector<8x256xf32>
    %38 = tpu.matmul %37, %35, %cst_19 {dimension_numbers = #tpu.dot_dimension_numbers<[1], [0], [0], [1], [0, 0, 1, 1], [], []>} : vector<8x12xf32>, vector<12x256xf32>, vector<8x256xf32> -> vector<8x256xf32>
    %39 = arith.addf %32, %38 : vector<8x256xf32>
    %40 = vector.broadcast %5 : vector<8x1xf32> to vector<8x256xf32>
    %41 = arith.addf %39, %40 : vector<8x256xf32>
    %cst_20 = arith.constant 0.000000e+00 : f32
    %42 = vector.broadcast %cst_20 : f32 to vector<8x256xf32>
    %43 = arith.cmpf oge, %41, %42 : vector<8x256xf32>
    %cst_21 = arith.constant 0.00999999977 : f32
    %44 = vector.broadcast %cst_21 : f32 to vector<8x256xf32>
    %45 = arith.mulf %44, %41 : vector<8x256xf32>
    %46 = arith.select %43, %41, %45 : vector<8x256xi1>, vector<8x256xf32>
    %cst_22 = arith.constant 0.000000e+00 : f32
    %47 = vector.broadcast %cst_22 : f32 to vector<8x1xf32>
    %48 = vector.extract_strided_slice %46 {offsets = [0, 1], sizes = [8, 255], strides = [1, 1]} : vector<8x256xf32> to vector<8x255xf32>
    %49 = tpu.concatenate %48, %47 in 1 : vector<8x255xf32>, vector<8x1xf32> -> vector<8x256xf32>
    %50 = arith.maximumf %46, %49 : vector<8x256xf32>
    %cst_23 = arith.constant 0.000000e+00 : f32
    %51 = vector.broadcast %cst_23 : f32 to vector<8x16xf32>
    %52 = vector.extract_strided_slice %50 {offsets = [0, 16], sizes = [8, 240], strides = [1, 1]} : vector<8x256xf32> to vector<8x240xf32>
    %53 = tpu.concatenate %52, %51 in 1 : vector<8x240xf32>, vector<8x16xf32> -> vector<8x256xf32>
    %54 = arith.maximumf %50, %53 : vector<8x256xf32>
    %cst_24 = arith.constant dense<0.000000e+00> : vector<8x64xf32>
    %55 = tpu.matmul %54, %7, %cst_24 {dimension_numbers = #tpu.dot_dimension_numbers<[1], [0], [0], [1], [0, 0, 1, 1], [], []>} : vector<8x256xf32>, vector<256x64xf32>, vector<8x64xf32> -> vector<8x64xf32>
    %cst_25 = arith.constant 0.000000e+00 : f32
    %56 = vector.broadcast %cst_25 : f32 to vector<4x1xf32>
    %57 = vector.extract_strided_slice %3 {offsets = [0, 0], sizes = [4, 255], strides = [1, 1]} : vector<4x256xf32> to vector<4x255xf32>
    %58 = tpu.concatenate %56, %57 in 1 : vector<4x1xf32>, vector<4x255xf32> -> vector<4x256xf32>
    %59 = vector.extract_strided_slice %6 {offsets = [0, 0], sizes = [1, 256], strides = [1, 1]} : vector<3x256xf32> to vector<1x256xf32>
    %60 = vector.broadcast %59 : vector<1x256xf32> to vector<4x256xf32>
    %61 = arith.mulf %58, %60 : vector<4x256xf32>
    %cst_26 = arith.constant 0.000000e+00 : f32
    %62 = vector.broadcast %cst_26 : f32 to vector<4x1xf32>
    %63 = vector.extract_strided_slice %3 {offsets = [0, 1], sizes = [4, 255], strides = [1, 1]} : vector<4x256xf32> to vector<4x255xf32>
    %64 = tpu.concatenate %63, %62 in 1 : vector<4x255xf32>, vector<4x1xf32> -> vector<4x256xf32>
    %65 = vector.extract_strided_slice %6 {offsets = [2, 0], sizes = [1, 256], strides = [1, 1]} : vector<3x256xf32> to vector<1x256xf32>
    %66 = vector.broadcast %65 : vector<1x256xf32> to vector<4x256xf32>
    %67 = arith.mulf %64, %66 : vector<4x256xf32>
    %68 = tpu.concatenate %61, %3, %67 in 0 : vector<4x256xf32>, vector<4x256xf32>, vector<4x256xf32> -> vector<12x256xf32>
    %cst_27 = arith.constant 0.000000e+00 : f32
    %69 = vector.broadcast %cst_27 : f32 to vector<8x256xf32>
    %cst_28 = arith.constant 0.000000e+00 : f32
    %70 = vector.broadcast %cst_28 : f32 to vector<12x16xf32>
    %71 = vector.extract_strided_slice %68 {offsets = [0, 0], sizes = [12, 240], strides = [1, 1]} : vector<12x256xf32> to vector<12x240xf32>
    %72 = tpu.concatenate %70, %71 in 1 : vector<12x16xf32>, vector<12x240xf32> -> vector<12x256xf32>
    %73 = vector.extract_strided_slice %4 {offsets = [0, 0, 0], sizes = [1, 8, 12], strides = [1, 1, 1]} : vector<3x8x12xf32> to vector<1x8x12xf32>
    %74 = vector.shape_cast %73 : vector<1x8x12xf32> to vector<8x12xf32>
    %cst_29 = arith.constant dense<0.000000e+00> : vector<8x256xf32>
    %75 = tpu.matmul %74, %72, %cst_29 {dimension_numbers = #tpu.dot_dimension_numbers<[1], [0], [0], [1], [0, 0, 1, 1], [], []>} : vector<8x12xf32>, vector<12x256xf32>, vector<8x256xf32> -> vector<8x256xf32>
    %76 = arith.addf %69, %75 : vector<8x256xf32>
    %77 = vector.extract_strided_slice %4 {offsets = [1, 0, 0], sizes = [1, 8, 12], strides = [1, 1, 1]} : vector<3x8x12xf32> to vector<1x8x12xf32>
    %78 = vector.shape_cast %77 : vector<1x8x12xf32> to vector<8x12xf32>
    %cst_30 = arith.constant dense<0.000000e+00> : vector<8x256xf32>
    %79 = tpu.matmul %78, %68, %cst_30 {dimension_numbers = #tpu.dot_dimension_numbers<[1], [0], [0], [1], [0, 0, 1, 1], [], []>} : vector<8x12xf32>, vector<12x256xf32>, vector<8x256xf32> -> vector<8x256xf32>
    %80 = arith.addf %76, %79 : vector<8x256xf32>
    %cst_31 = arith.constant 0.000000e+00 : f32
    %81 = vector.broadcast %cst_31 : f32 to vector<12x16xf32>
    %82 = vector.extract_strided_slice %68 {offsets = [0, 16], sizes = [12, 240], strides = [1, 1]} : vector<12x256xf32> to vector<12x240xf32>
    %83 = tpu.concatenate %82, %81 in 1 : vector<12x240xf32>, vector<12x16xf32> -> vector<12x256xf32>
    %84 = vector.extract_strided_slice %4 {offsets = [2, 0, 0], sizes = [1, 8, 12], strides = [1, 1, 1]} : vector<3x8x12xf32> to vector<1x8x12xf32>
    %85 = vector.shape_cast %84 : vector<1x8x12xf32> to vector<8x12xf32>
    %cst_32 = arith.constant dense<0.000000e+00> : vector<8x256xf32>
    %86 = tpu.matmul %85, %83, %cst_32 {dimension_numbers = #tpu.dot_dimension_numbers<[1], [0], [0], [1], [0, 0, 1, 1], [], []>} : vector<8x12xf32>, vector<12x256xf32>, vector<8x256xf32> -> vector<8x256xf32>
    %87 = arith.addf %80, %86 : vector<8x256xf32>
    %88 = vector.broadcast %5 : vector<8x1xf32> to vector<8x256xf32>
    %89 = arith.addf %87, %88 : vector<8x256xf32>
    %cst_33 = arith.constant 0.000000e+00 : f32
    %90 = vector.broadcast %cst_33 : f32 to vector<8x256xf32>
    %91 = arith.cmpf oge, %89, %90 : vector<8x256xf32>
    %cst_34 = arith.constant 0.00999999977 : f32
    %92 = vector.broadcast %cst_34 : f32 to vector<8x256xf32>
    %93 = arith.mulf %92, %89 : vector<8x256xf32>
    %94 = arith.select %91, %89, %93 : vector<8x256xi1>, vector<8x256xf32>
    %cst_35 = arith.constant 0.000000e+00 : f32
    %95 = vector.broadcast %cst_35 : f32 to vector<8x1xf32>
    %96 = vector.extract_strided_slice %94 {offsets = [0, 1], sizes = [8, 255], strides = [1, 1]} : vector<8x256xf32> to vector<8x255xf32>
    %97 = tpu.concatenate %96, %95 in 1 : vector<8x255xf32>, vector<8x1xf32> -> vector<8x256xf32>
    %98 = arith.maximumf %94, %97 : vector<8x256xf32>
    %cst_36 = arith.constant 0.000000e+00 : f32
    %99 = vector.broadcast %cst_36 : f32 to vector<8x16xf32>
    %100 = vector.extract_strided_slice %98 {offsets = [0, 16], sizes = [8, 240], strides = [1, 1]} : vector<8x256xf32> to vector<8x240xf32>
    %101 = tpu.concatenate %100, %99 in 1 : vector<8x240xf32>, vector<8x16xf32> -> vector<8x256xf32>
    %102 = arith.maximumf %98, %101 : vector<8x256xf32>
    %cst_37 = arith.constant dense<0.000000e+00> : vector<8x64xf32>
    %103 = tpu.matmul %102, %7, %cst_37 {dimension_numbers = #tpu.dot_dimension_numbers<[1], [0], [0], [1], [0, 0, 1, 1], [], []>} : vector<8x256xf32>, vector<256x64xf32>, vector<8x64xf32> -> vector<8x64xf32>
    %c0_38 = arith.constant 0 : index
    %c0_39 = arith.constant 0 : index
    %c0_40 = arith.constant 0 : index
    %104 = vector.load %arg6[%c0_38, %c0_39, %c0_40] : memref<3x8x24xf32, #tpu.memory_space<vmem>>, vector<3x8x24xf32>
    %c0_41 = arith.constant 0 : index
    %c0_42 = arith.constant 0 : index
    %105 = vector.load %arg7[%c0_41, %c0_42] : memref<8x1xf32, #tpu.memory_space<vmem>>, vector<8x1xf32>
    %c0_43 = arith.constant 0 : index
    %c0_44 = arith.constant 0 : index
    %106 = vector.load %arg8[%c0_43, %c0_44] : memref<3x64xf32, #tpu.memory_space<vmem>>, vector<3x64xf32>
    %c0_45 = arith.constant 0 : index
    %c0_46 = arith.constant 0 : index
    %107 = vector.load %arg9[%c0_45, %c0_46] : memref<64x16xf32, #tpu.memory_space<vmem>>, vector<64x16xf32>
    %cst_47 = arith.constant 0.000000e+00 : f32
    %108 = vector.broadcast %cst_47 : f32 to vector<8x1xf32>
    %109 = vector.extract_strided_slice %55 {offsets = [0, 0], sizes = [8, 63], strides = [1, 1]} : vector<8x64xf32> to vector<8x63xf32>
    %110 = tpu.concatenate %108, %109 in 1 : vector<8x1xf32>, vector<8x63xf32> -> vector<8x64xf32>
    %111 = vector.extract_strided_slice %106 {offsets = [0, 0], sizes = [1, 64], strides = [1, 1]} : vector<3x64xf32> to vector<1x64xf32>
    %112 = vector.broadcast %111 : vector<1x64xf32> to vector<8x64xf32>
    %113 = arith.mulf %110, %112 : vector<8x64xf32>
    %cst_48 = arith.constant 0.000000e+00 : f32
    %114 = vector.broadcast %cst_48 : f32 to vector<8x1xf32>
    %115 = vector.extract_strided_slice %55 {offsets = [0, 1], sizes = [8, 63], strides = [1, 1]} : vector<8x64xf32> to vector<8x63xf32>
    %116 = tpu.concatenate %115, %114 in 1 : vector<8x63xf32>, vector<8x1xf32> -> vector<8x64xf32>
    %117 = vector.extract_strided_slice %106 {offsets = [2, 0], sizes = [1, 64], strides = [1, 1]} : vector<3x64xf32> to vector<1x64xf32>
    %118 = vector.broadcast %117 : vector<1x64xf32> to vector<8x64xf32>
    %119 = arith.mulf %116, %118 : vector<8x64xf32>
    %120 = tpu.concatenate %113, %55, %119 in 0 : vector<8x64xf32>, vector<8x64xf32>, vector<8x64xf32> -> vector<24x64xf32>
    %cst_49 = arith.constant 0.000000e+00 : f32
    %121 = vector.broadcast %cst_49 : f32 to vector<8x64xf32>
    %cst_50 = arith.constant 0.000000e+00 : f32
    %122 = vector.broadcast %cst_50 : f32 to vector<24x8xf32>
    %123 = vector.extract_strided_slice %120 {offsets = [0, 0], sizes = [24, 56], strides = [1, 1]} : vector<24x64xf32> to vector<24x56xf32>
    %124 = tpu.concatenate %122, %123 in 1 : vector<24x8xf32>, vector<24x56xf32> -> vector<24x64xf32>
    %125 = vector.extract_strided_slice %104 {offsets = [0, 0, 0], sizes = [1, 8, 24], strides = [1, 1, 1]} : vector<3x8x24xf32> to vector<1x8x24xf32>
    %126 = vector.shape_cast %125 : vector<1x8x24xf32> to vector<8x24xf32>
    %cst_51 = arith.constant dense<0.000000e+00> : vector<8x64xf32>
    %127 = tpu.matmul %126, %124, %cst_51 {dimension_numbers = #tpu.dot_dimension_numbers<[1], [0], [0], [1], [0, 0, 1, 1], [], []>} : vector<8x24xf32>, vector<24x64xf32>, vector<8x64xf32> -> vector<8x64xf32>
    %128 = arith.addf %121, %127 : vector<8x64xf32>
    %129 = vector.extract_strided_slice %104 {offsets = [1, 0, 0], sizes = [1, 8, 24], strides = [1, 1, 1]} : vector<3x8x24xf32> to vector<1x8x24xf32>
    %130 = vector.shape_cast %129 : vector<1x8x24xf32> to vector<8x24xf32>
    %cst_52 = arith.constant dense<0.000000e+00> : vector<8x64xf32>
    %131 = tpu.matmul %130, %120, %cst_52 {dimension_numbers = #tpu.dot_dimension_numbers<[1], [0], [0], [1], [0, 0, 1, 1], [], []>} : vector<8x24xf32>, vector<24x64xf32>, vector<8x64xf32> -> vector<8x64xf32>
    %132 = arith.addf %128, %131 : vector<8x64xf32>
    %cst_53 = arith.constant 0.000000e+00 : f32
    %133 = vector.broadcast %cst_53 : f32 to vector<24x8xf32>
    %134 = vector.extract_strided_slice %120 {offsets = [0, 8], sizes = [24, 56], strides = [1, 1]} : vector<24x64xf32> to vector<24x56xf32>
    %135 = tpu.concatenate %134, %133 in 1 : vector<24x56xf32>, vector<24x8xf32> -> vector<24x64xf32>
    %136 = vector.extract_strided_slice %104 {offsets = [2, 0, 0], sizes = [1, 8, 24], strides = [1, 1, 1]} : vector<3x8x24xf32> to vector<1x8x24xf32>
    %137 = vector.shape_cast %136 : vector<1x8x24xf32> to vector<8x24xf32>
    %cst_54 = arith.constant dense<0.000000e+00> : vector<8x64xf32>
    %138 = tpu.matmul %137, %135, %cst_54 {dimension_numbers = #tpu.dot_dimension_numbers<[1], [0], [0], [1], [0, 0, 1, 1], [], []>} : vector<8x24xf32>, vector<24x64xf32>, vector<8x64xf32> -> vector<8x64xf32>
    %139 = arith.addf %132, %138 : vector<8x64xf32>
    %140 = vector.broadcast %105 : vector<8x1xf32> to vector<8x64xf32>
    %141 = arith.addf %139, %140 : vector<8x64xf32>
    %cst_55 = arith.constant 0.000000e+00 : f32
    %142 = vector.broadcast %cst_55 : f32 to vector<8x64xf32>
    %143 = arith.cmpf oge, %141, %142 : vector<8x64xf32>
    %cst_56 = arith.constant 0.00999999977 : f32
    %144 = vector.broadcast %cst_56 : f32 to vector<8x64xf32>
    %145 = arith.mulf %144, %141 : vector<8x64xf32>
    %146 = arith.select %143, %141, %145 : vector<8x64xi1>, vector<8x64xf32>
    %cst_57 = arith.constant 0.000000e+00 : f32
    %147 = vector.broadcast %cst_57 : f32 to vector<8x1xf32>
    %148 = vector.extract_strided_slice %146 {offsets = [0, 1], sizes = [8, 63], strides = [1, 1]} : vector<8x64xf32> to vector<8x63xf32>
    %149 = tpu.concatenate %148, %147 in 1 : vector<8x63xf32>, vector<8x1xf32> -> vector<8x64xf32>
    %150 = arith.maximumf %146, %149 : vector<8x64xf32>
    %cst_58 = arith.constant 0.000000e+00 : f32
    %151 = vector.broadcast %cst_58 : f32 to vector<8x8xf32>
    %152 = vector.extract_strided_slice %150 {offsets = [0, 8], sizes = [8, 56], strides = [1, 1]} : vector<8x64xf32> to vector<8x56xf32>
    %153 = tpu.concatenate %152, %151 in 1 : vector<8x56xf32>, vector<8x8xf32> -> vector<8x64xf32>
    %154 = arith.maximumf %150, %153 : vector<8x64xf32>
    %cst_59 = arith.constant dense<0.000000e+00> : vector<8x16xf32>
    %155 = tpu.matmul %154, %107, %cst_59 {dimension_numbers = #tpu.dot_dimension_numbers<[1], [0], [0], [1], [0, 0, 1, 1], [], []>} : vector<8x64xf32>, vector<64x16xf32>, vector<8x16xf32> -> vector<8x16xf32>
    %cst_60 = arith.constant 0.000000e+00 : f32
    %156 = vector.broadcast %cst_60 : f32 to vector<8x1xf32>
    %157 = vector.extract_strided_slice %103 {offsets = [0, 0], sizes = [8, 63], strides = [1, 1]} : vector<8x64xf32> to vector<8x63xf32>
    %158 = tpu.concatenate %156, %157 in 1 : vector<8x1xf32>, vector<8x63xf32> -> vector<8x64xf32>
    %159 = vector.extract_strided_slice %106 {offsets = [0, 0], sizes = [1, 64], strides = [1, 1]} : vector<3x64xf32> to vector<1x64xf32>
    %160 = vector.broadcast %159 : vector<1x64xf32> to vector<8x64xf32>
    %161 = arith.mulf %158, %160 : vector<8x64xf32>
    %cst_61 = arith.constant 0.000000e+00 : f32
    %162 = vector.broadcast %cst_61 : f32 to vector<8x1xf32>
    %163 = vector.extract_strided_slice %103 {offsets = [0, 1], sizes = [8, 63], strides = [1, 1]} : vector<8x64xf32> to vector<8x63xf32>
    %164 = tpu.concatenate %163, %162 in 1 : vector<8x63xf32>, vector<8x1xf32> -> vector<8x64xf32>
    %165 = vector.extract_strided_slice %106 {offsets = [2, 0], sizes = [1, 64], strides = [1, 1]} : vector<3x64xf32> to vector<1x64xf32>
    %166 = vector.broadcast %165 : vector<1x64xf32> to vector<8x64xf32>
    %167 = arith.mulf %164, %166 : vector<8x64xf32>
    %168 = tpu.concatenate %161, %103, %167 in 0 : vector<8x64xf32>, vector<8x64xf32>, vector<8x64xf32> -> vector<24x64xf32>
    %cst_62 = arith.constant 0.000000e+00 : f32
    %169 = vector.broadcast %cst_62 : f32 to vector<8x64xf32>
    %cst_63 = arith.constant 0.000000e+00 : f32
    %170 = vector.broadcast %cst_63 : f32 to vector<24x8xf32>
    %171 = vector.extract_strided_slice %168 {offsets = [0, 0], sizes = [24, 56], strides = [1, 1]} : vector<24x64xf32> to vector<24x56xf32>
    %172 = tpu.concatenate %170, %171 in 1 : vector<24x8xf32>, vector<24x56xf32> -> vector<24x64xf32>
    %173 = vector.extract_strided_slice %104 {offsets = [0, 0, 0], sizes = [1, 8, 24], strides = [1, 1, 1]} : vector<3x8x24xf32> to vector<1x8x24xf32>
    %174 = vector.shape_cast %173 : vector<1x8x24xf32> to vector<8x24xf32>
    %cst_64 = arith.constant dense<0.000000e+00> : vector<8x64xf32>
    %175 = tpu.matmul %174, %172, %cst_64 {dimension_numbers = #tpu.dot_dimension_numbers<[1], [0], [0], [1], [0, 0, 1, 1], [], []>} : vector<8x24xf32>, vector<24x64xf32>, vector<8x64xf32> -> vector<8x64xf32>
    %176 = arith.addf %169, %175 : vector<8x64xf32>
    %177 = vector.extract_strided_slice %104 {offsets = [1, 0, 0], sizes = [1, 8, 24], strides = [1, 1, 1]} : vector<3x8x24xf32> to vector<1x8x24xf32>
    %178 = vector.shape_cast %177 : vector<1x8x24xf32> to vector<8x24xf32>
    %cst_65 = arith.constant dense<0.000000e+00> : vector<8x64xf32>
    %179 = tpu.matmul %178, %168, %cst_65 {dimension_numbers = #tpu.dot_dimension_numbers<[1], [0], [0], [1], [0, 0, 1, 1], [], []>} : vector<8x24xf32>, vector<24x64xf32>, vector<8x64xf32> -> vector<8x64xf32>
    %180 = arith.addf %176, %179 : vector<8x64xf32>
    %cst_66 = arith.constant 0.000000e+00 : f32
    %181 = vector.broadcast %cst_66 : f32 to vector<24x8xf32>
    %182 = vector.extract_strided_slice %168 {offsets = [0, 8], sizes = [24, 56], strides = [1, 1]} : vector<24x64xf32> to vector<24x56xf32>
    %183 = tpu.concatenate %182, %181 in 1 : vector<24x56xf32>, vector<24x8xf32> -> vector<24x64xf32>
    %184 = vector.extract_strided_slice %104 {offsets = [2, 0, 0], sizes = [1, 8, 24], strides = [1, 1, 1]} : vector<3x8x24xf32> to vector<1x8x24xf32>
    %185 = vector.shape_cast %184 : vector<1x8x24xf32> to vector<8x24xf32>
    %cst_67 = arith.constant dense<0.000000e+00> : vector<8x64xf32>
    %186 = tpu.matmul %185, %183, %cst_67 {dimension_numbers = #tpu.dot_dimension_numbers<[1], [0], [0], [1], [0, 0, 1, 1], [], []>} : vector<8x24xf32>, vector<24x64xf32>, vector<8x64xf32> -> vector<8x64xf32>
    %187 = arith.addf %180, %186 : vector<8x64xf32>
    %188 = vector.broadcast %105 : vector<8x1xf32> to vector<8x64xf32>
    %189 = arith.addf %187, %188 : vector<8x64xf32>
    %cst_68 = arith.constant 0.000000e+00 : f32
    %190 = vector.broadcast %cst_68 : f32 to vector<8x64xf32>
    %191 = arith.cmpf oge, %189, %190 : vector<8x64xf32>
    %cst_69 = arith.constant 0.00999999977 : f32
    %192 = vector.broadcast %cst_69 : f32 to vector<8x64xf32>
    %193 = arith.mulf %192, %189 : vector<8x64xf32>
    %194 = arith.select %191, %189, %193 : vector<8x64xi1>, vector<8x64xf32>
    %cst_70 = arith.constant 0.000000e+00 : f32
    %195 = vector.broadcast %cst_70 : f32 to vector<8x1xf32>
    %196 = vector.extract_strided_slice %194 {offsets = [0, 1], sizes = [8, 63], strides = [1, 1]} : vector<8x64xf32> to vector<8x63xf32>
    %197 = tpu.concatenate %196, %195 in 1 : vector<8x63xf32>, vector<8x1xf32> -> vector<8x64xf32>
    %198 = arith.maximumf %194, %197 : vector<8x64xf32>
    %cst_71 = arith.constant 0.000000e+00 : f32
    %199 = vector.broadcast %cst_71 : f32 to vector<8x8xf32>
    %200 = vector.extract_strided_slice %198 {offsets = [0, 8], sizes = [8, 56], strides = [1, 1]} : vector<8x64xf32> to vector<8x56xf32>
    %201 = tpu.concatenate %200, %199 in 1 : vector<8x56xf32>, vector<8x8xf32> -> vector<8x64xf32>
    %202 = arith.maximumf %198, %201 : vector<8x64xf32>
    %cst_72 = arith.constant dense<0.000000e+00> : vector<8x16xf32>
    %203 = tpu.matmul %202, %107, %cst_72 {dimension_numbers = #tpu.dot_dimension_numbers<[1], [0], [0], [1], [0, 0, 1, 1], [], []>} : vector<8x64xf32>, vector<64x16xf32>, vector<8x16xf32> -> vector<8x16xf32>
    %c0_73 = arith.constant 0 : index
    %c0_74 = arith.constant 0 : index
    %c0_75 = arith.constant 0 : index
    %204 = vector.load %arg10[%c0_73, %c0_74, %c0_75] : memref<3x8x24xf32, #tpu.memory_space<vmem>>, vector<3x8x24xf32>
    %c0_76 = arith.constant 0 : index
    %c0_77 = arith.constant 0 : index
    %205 = vector.load %arg11[%c0_76, %c0_77] : memref<8x1xf32, #tpu.memory_space<vmem>>, vector<8x1xf32>
    %c0_78 = arith.constant 0 : index
    %c0_79 = arith.constant 0 : index
    %206 = vector.load %arg12[%c0_78, %c0_79] : memref<3x16xf32, #tpu.memory_space<vmem>>, vector<3x16xf32>
    %c0_80 = arith.constant 0 : index
    %c0_81 = arith.constant 0 : index
    %207 = vector.load %arg13[%c0_80, %c0_81] : memref<16x4xf32, #tpu.memory_space<vmem>>, vector<16x4xf32>
    %cst_82 = arith.constant 0.000000e+00 : f32
    %208 = vector.broadcast %cst_82 : f32 to vector<8x1xf32>
    %209 = vector.extract_strided_slice %155 {offsets = [0, 0], sizes = [8, 15], strides = [1, 1]} : vector<8x16xf32> to vector<8x15xf32>
    %210 = tpu.concatenate %208, %209 in 1 : vector<8x1xf32>, vector<8x15xf32> -> vector<8x16xf32>
    %211 = vector.extract_strided_slice %206 {offsets = [0, 0], sizes = [1, 16], strides = [1, 1]} : vector<3x16xf32> to vector<1x16xf32>
    %212 = vector.broadcast %211 : vector<1x16xf32> to vector<8x16xf32>
    %213 = arith.mulf %210, %212 : vector<8x16xf32>
    %cst_83 = arith.constant 0.000000e+00 : f32
    %214 = vector.broadcast %cst_83 : f32 to vector<8x1xf32>
    %215 = vector.extract_strided_slice %155 {offsets = [0, 1], sizes = [8, 15], strides = [1, 1]} : vector<8x16xf32> to vector<8x15xf32>
    %216 = tpu.concatenate %215, %214 in 1 : vector<8x15xf32>, vector<8x1xf32> -> vector<8x16xf32>
    %217 = vector.extract_strided_slice %206 {offsets = [2, 0], sizes = [1, 16], strides = [1, 1]} : vector<3x16xf32> to vector<1x16xf32>
    %218 = vector.broadcast %217 : vector<1x16xf32> to vector<8x16xf32>
    %219 = arith.mulf %216, %218 : vector<8x16xf32>
    %220 = tpu.concatenate %213, %155, %219 in 0 : vector<8x16xf32>, vector<8x16xf32>, vector<8x16xf32> -> vector<24x16xf32>
    %cst_84 = arith.constant 0.000000e+00 : f32
    %221 = vector.broadcast %cst_84 : f32 to vector<8x16xf32>
    %cst_85 = arith.constant 0.000000e+00 : f32
    %222 = vector.broadcast %cst_85 : f32 to vector<24x4xf32>
    %223 = vector.extract_strided_slice %220 {offsets = [0, 0], sizes = [24, 12], strides = [1, 1]} : vector<24x16xf32> to vector<24x12xf32>
    %224 = tpu.concatenate %222, %223 in 1 : vector<24x4xf32>, vector<24x12xf32> -> vector<24x16xf32>
    %225 = vector.extract_strided_slice %204 {offsets = [0, 0, 0], sizes = [1, 8, 24], strides = [1, 1, 1]} : vector<3x8x24xf32> to vector<1x8x24xf32>
    %226 = vector.shape_cast %225 : vector<1x8x24xf32> to vector<8x24xf32>
    %cst_86 = arith.constant dense<0.000000e+00> : vector<8x16xf32>
    %227 = tpu.matmul %226, %224, %cst_86 {dimension_numbers = #tpu.dot_dimension_numbers<[1], [0], [0], [1], [0, 0, 1, 1], [], []>} : vector<8x24xf32>, vector<24x16xf32>, vector<8x16xf32> -> vector<8x16xf32>
    %228 = arith.addf %221, %227 : vector<8x16xf32>
    %229 = vector.extract_strided_slice %204 {offsets = [1, 0, 0], sizes = [1, 8, 24], strides = [1, 1, 1]} : vector<3x8x24xf32> to vector<1x8x24xf32>
    %230 = vector.shape_cast %229 : vector<1x8x24xf32> to vector<8x24xf32>
    %cst_87 = arith.constant dense<0.000000e+00> : vector<8x16xf32>
    %231 = tpu.matmul %230, %220, %cst_87 {dimension_numbers = #tpu.dot_dimension_numbers<[1], [0], [0], [1], [0, 0, 1, 1], [], []>} : vector<8x24xf32>, vector<24x16xf32>, vector<8x16xf32> -> vector<8x16xf32>
    %232 = arith.addf %228, %231 : vector<8x16xf32>
    %cst_88 = arith.constant 0.000000e+00 : f32
    %233 = vector.broadcast %cst_88 : f32 to vector<24x4xf32>
    %234 = vector.extract_strided_slice %220 {offsets = [0, 4], sizes = [24, 12], strides = [1, 1]} : vector<24x16xf32> to vector<24x12xf32>
    %235 = tpu.concatenate %234, %233 in 1 : vector<24x12xf32>, vector<24x4xf32> -> vector<24x16xf32>
    %236 = vector.extract_strided_slice %204 {offsets = [2, 0, 0], sizes = [1, 8, 24], strides = [1, 1, 1]} : vector<3x8x24xf32> to vector<1x8x24xf32>
    %237 = vector.shape_cast %236 : vector<1x8x24xf32> to vector<8x24xf32>
    %cst_89 = arith.constant dense<0.000000e+00> : vector<8x16xf32>
    %238 = tpu.matmul %237, %235, %cst_89 {dimension_numbers = #tpu.dot_dimension_numbers<[1], [0], [0], [1], [0, 0, 1, 1], [], []>} : vector<8x24xf32>, vector<24x16xf32>, vector<8x16xf32> -> vector<8x16xf32>
    %239 = arith.addf %232, %238 : vector<8x16xf32>
    %240 = vector.broadcast %205 : vector<8x1xf32> to vector<8x16xf32>
    %241 = arith.addf %239, %240 : vector<8x16xf32>
    %cst_90 = arith.constant 0.000000e+00 : f32
    %242 = vector.broadcast %cst_90 : f32 to vector<8x16xf32>
    %243 = arith.cmpf oge, %241, %242 : vector<8x16xf32>
    %cst_91 = arith.constant 0.00999999977 : f32
    %244 = vector.broadcast %cst_91 : f32 to vector<8x16xf32>
    %245 = arith.mulf %244, %241 : vector<8x16xf32>
    %246 = arith.select %243, %241, %245 : vector<8x16xi1>, vector<8x16xf32>
    %cst_92 = arith.constant 0.000000e+00 : f32
    %247 = vector.broadcast %cst_92 : f32 to vector<8x1xf32>
    %248 = vector.extract_strided_slice %246 {offsets = [0, 1], sizes = [8, 15], strides = [1, 1]} : vector<8x16xf32> to vector<8x15xf32>
    %249 = tpu.concatenate %248, %247 in 1 : vector<8x15xf32>, vector<8x1xf32> -> vector<8x16xf32>
    %250 = arith.maximumf %246, %249 : vector<8x16xf32>
    %cst_93 = arith.constant 0.000000e+00 : f32
    %251 = vector.broadcast %cst_93 : f32 to vector<8x4xf32>
    %252 = vector.extract_strided_slice %250 {offsets = [0, 4], sizes = [8, 12], strides = [1, 1]} : vector<8x16xf32> to vector<8x12xf32>
    %253 = tpu.concatenate %252, %251 in 1 : vector<8x12xf32>, vector<8x4xf32> -> vector<8x16xf32>
    %254 = arith.maximumf %250, %253 : vector<8x16xf32>
    %cst_94 = arith.constant dense<0.000000e+00> : vector<8x4xf32>
    %255 = tpu.matmul %254, %207, %cst_94 {dimension_numbers = #tpu.dot_dimension_numbers<[1], [0], [0], [1], [0, 0, 1, 1], [], []>} : vector<8x16xf32>, vector<16x4xf32>, vector<8x4xf32> -> vector<8x4xf32>
    %cst_95 = arith.constant 0.000000e+00 : f32
    %256 = vector.broadcast %cst_95 : f32 to vector<8x1xf32>
    %257 = vector.extract_strided_slice %203 {offsets = [0, 0], sizes = [8, 15], strides = [1, 1]} : vector<8x16xf32> to vector<8x15xf32>
    %258 = tpu.concatenate %256, %257 in 1 : vector<8x1xf32>, vector<8x15xf32> -> vector<8x16xf32>
    %259 = vector.extract_strided_slice %206 {offsets = [0, 0], sizes = [1, 16], strides = [1, 1]} : vector<3x16xf32> to vector<1x16xf32>
    %260 = vector.broadcast %259 : vector<1x16xf32> to vector<8x16xf32>
    %261 = arith.mulf %258, %260 : vector<8x16xf32>
    %cst_96 = arith.constant 0.000000e+00 : f32
    %262 = vector.broadcast %cst_96 : f32 to vector<8x1xf32>
    %263 = vector.extract_strided_slice %203 {offsets = [0, 1], sizes = [8, 15], strides = [1, 1]} : vector<8x16xf32> to vector<8x15xf32>
    %264 = tpu.concatenate %263, %262 in 1 : vector<8x15xf32>, vector<8x1xf32> -> vector<8x16xf32>
    %265 = vector.extract_strided_slice %206 {offsets = [2, 0], sizes = [1, 16], strides = [1, 1]} : vector<3x16xf32> to vector<1x16xf32>
    %266 = vector.broadcast %265 : vector<1x16xf32> to vector<8x16xf32>
    %267 = arith.mulf %264, %266 : vector<8x16xf32>
    %268 = tpu.concatenate %261, %203, %267 in 0 : vector<8x16xf32>, vector<8x16xf32>, vector<8x16xf32> -> vector<24x16xf32>
    %cst_97 = arith.constant 0.000000e+00 : f32
    %269 = vector.broadcast %cst_97 : f32 to vector<8x16xf32>
    %cst_98 = arith.constant 0.000000e+00 : f32
    %270 = vector.broadcast %cst_98 : f32 to vector<24x4xf32>
    %271 = vector.extract_strided_slice %268 {offsets = [0, 0], sizes = [24, 12], strides = [1, 1]} : vector<24x16xf32> to vector<24x12xf32>
    %272 = tpu.concatenate %270, %271 in 1 : vector<24x4xf32>, vector<24x12xf32> -> vector<24x16xf32>
    %273 = vector.extract_strided_slice %204 {offsets = [0, 0, 0], sizes = [1, 8, 24], strides = [1, 1, 1]} : vector<3x8x24xf32> to vector<1x8x24xf32>
    %274 = vector.shape_cast %273 : vector<1x8x24xf32> to vector<8x24xf32>
    %cst_99 = arith.constant dense<0.000000e+00> : vector<8x16xf32>
    %275 = tpu.matmul %274, %272, %cst_99 {dimension_numbers = #tpu.dot_dimension_numbers<[1], [0], [0], [1], [0, 0, 1, 1], [], []>} : vector<8x24xf32>, vector<24x16xf32>, vector<8x16xf32> -> vector<8x16xf32>
    %276 = arith.addf %269, %275 : vector<8x16xf32>
    %277 = vector.extract_strided_slice %204 {offsets = [1, 0, 0], sizes = [1, 8, 24], strides = [1, 1, 1]} : vector<3x8x24xf32> to vector<1x8x24xf32>
    %278 = vector.shape_cast %277 : vector<1x8x24xf32> to vector<8x24xf32>
    %cst_100 = arith.constant dense<0.000000e+00> : vector<8x16xf32>
    %279 = tpu.matmul %278, %268, %cst_100 {dimension_numbers = #tpu.dot_dimension_numbers<[1], [0], [0], [1], [0, 0, 1, 1], [], []>} : vector<8x24xf32>, vector<24x16xf32>, vector<8x16xf32> -> vector<8x16xf32>
    %280 = arith.addf %276, %279 : vector<8x16xf32>
    %cst_101 = arith.constant 0.000000e+00 : f32
    %281 = vector.broadcast %cst_101 : f32 to vector<24x4xf32>
    %282 = vector.extract_strided_slice %268 {offsets = [0, 4], sizes = [24, 12], strides = [1, 1]} : vector<24x16xf32> to vector<24x12xf32>
    %283 = tpu.concatenate %282, %281 in 1 : vector<24x12xf32>, vector<24x4xf32> -> vector<24x16xf32>
    %284 = vector.extract_strided_slice %204 {offsets = [2, 0, 0], sizes = [1, 8, 24], strides = [1, 1, 1]} : vector<3x8x24xf32> to vector<1x8x24xf32>
    %285 = vector.shape_cast %284 : vector<1x8x24xf32> to vector<8x24xf32>
    %cst_102 = arith.constant dense<0.000000e+00> : vector<8x16xf32>
    %286 = tpu.matmul %285, %283, %cst_102 {dimension_numbers = #tpu.dot_dimension_numbers<[1], [0], [0], [1], [0, 0, 1, 1], [], []>} : vector<8x24xf32>, vector<24x16xf32>, vector<8x16xf32> -> vector<8x16xf32>
    %287 = arith.addf %280, %286 : vector<8x16xf32>
    %288 = vector.broadcast %205 : vector<8x1xf32> to vector<8x16xf32>
    %289 = arith.addf %287, %288 : vector<8x16xf32>
    %cst_103 = arith.constant 0.000000e+00 : f32
    %290 = vector.broadcast %cst_103 : f32 to vector<8x16xf32>
    %291 = arith.cmpf oge, %289, %290 : vector<8x16xf32>
    %cst_104 = arith.constant 0.00999999977 : f32
    %292 = vector.broadcast %cst_104 : f32 to vector<8x16xf32>
    %293 = arith.mulf %292, %289 : vector<8x16xf32>
    %294 = arith.select %291, %289, %293 : vector<8x16xi1>, vector<8x16xf32>
    %cst_105 = arith.constant 0.000000e+00 : f32
    %295 = vector.broadcast %cst_105 : f32 to vector<8x1xf32>
    %296 = vector.extract_strided_slice %294 {offsets = [0, 1], sizes = [8, 15], strides = [1, 1]} : vector<8x16xf32> to vector<8x15xf32>
    %297 = tpu.concatenate %296, %295 in 1 : vector<8x15xf32>, vector<8x1xf32> -> vector<8x16xf32>
    %298 = arith.maximumf %294, %297 : vector<8x16xf32>
    %cst_106 = arith.constant 0.000000e+00 : f32
    %299 = vector.broadcast %cst_106 : f32 to vector<8x4xf32>
    %300 = vector.extract_strided_slice %298 {offsets = [0, 4], sizes = [8, 12], strides = [1, 1]} : vector<8x16xf32> to vector<8x12xf32>
    %301 = tpu.concatenate %300, %299 in 1 : vector<8x12xf32>, vector<8x4xf32> -> vector<8x16xf32>
    %302 = arith.maximumf %298, %301 : vector<8x16xf32>
    %cst_107 = arith.constant dense<0.000000e+00> : vector<8x4xf32>
    %303 = tpu.matmul %302, %207, %cst_107 {dimension_numbers = #tpu.dot_dimension_numbers<[1], [0], [0], [1], [0, 0, 1, 1], [], []>} : vector<8x16xf32>, vector<16x4xf32>, vector<8x4xf32> -> vector<8x4xf32>
    %c0_108 = arith.constant 0 : index
    %c0_109 = arith.constant 0 : index
    %c0_110 = arith.constant 0 : index
    %304 = vector.load %arg14[%c0_108, %c0_109, %c0_110] : memref<2x8x4xf32, #tpu.memory_space<vmem>>, vector<1x8x4xf32>
    %305 = vector.shape_cast %304 : vector<1x8x4xf32> to vector<8x4xf32>
    %306 = vector.shape_cast %255 : vector<8x4xf32> to vector<1x8x4xf32>
    tpu.vector_store %arg14[%c0_108, %c0_109, %c0_110], %306 {strides = array<i32>} : memref<2x8x4xf32, #tpu.memory_space<vmem>>, vector<1x8x4xf32>,
    %c1_111 = arith.constant 1 : index
    %c0_112 = arith.constant 0 : index
    %c0_113 = arith.constant 0 : index
    %307 = vector.load %arg14[%c1_111, %c0_112, %c0_113] : memref<2x8x4xf32, #tpu.memory_space<vmem>>, vector<1x8x4xf32>
    %308 = vector.shape_cast %307 : vector<1x8x4xf32> to vector<8x4xf32>
    %309 = vector.shape_cast %303 : vector<8x4xf32> to vector<1x8x4xf32>
    tpu.vector_store %arg14[%c1_111, %c0_112, %c0_113], %309 {strides = array<i32>} : memref<2x8x4xf32, #tpu.memory_space<vmem>>, vector<1x8x4xf32>,
    return
  }
  func.func @transform_0(%arg0: i32) -> (i32, i32, i32) {
    %c0_i32 = arith.constant 0 : i32
    %c0_i32_0 = arith.constant 0 : i32
    %c0_i32_1 = arith.constant 0 : i32
    return %arg0, %c0_i32, %c0_i32_0 : i32, i32, i32
  }
  func.func @transform_1(%arg0: i32) -> (i32, i32, i32) {
    %c0_i32 = arith.constant 0 : i32
    %c0_i32_0 = arith.constant 0 : i32
    %c0_i32_1 = arith.constant 0 : i32
    %c0_i32_2 = arith.constant 0 : i32
    return %c0_i32, %c0_i32_0, %c0_i32_1 : i32, i32, i32
  }
  func.func @transform_2(%arg0: i32) -> (i32, i32) {
    %c0_i32 = arith.constant 0 : i32
    %c0_i32_0 = arith.constant 0 : i32
    %c0_i32_1 = arith.constant 0 : i32
    return %c0_i32, %c0_i32_0 : i32, i32
  }
  func.func @transform_3(%arg0: i32) -> (i32, i32) {
    %c0_i32 = arith.constant 0 : i32
    %c0_i32_0 = arith.constant 0 : i32
    %c0_i32_1 = arith.constant 0 : i32
    return %c0_i32, %c0_i32_0 : i32, i32
  }
  func.func @transform_4(%arg0: i32) -> (i32, i32) {
    %c0_i32 = arith.constant 0 : i32
    %c0_i32_0 = arith.constant 0 : i32
    %c0_i32_1 = arith.constant 0 : i32
    return %c0_i32, %c0_i32_0 : i32, i32
  }
  func.func @transform_5(%arg0: i32) -> (i32, i32, i32) {
    %c0_i32 = arith.constant 0 : i32
    %c0_i32_0 = arith.constant 0 : i32
    %c0_i32_1 = arith.constant 0 : i32
    %c0_i32_2 = arith.constant 0 : i32
    return %c0_i32, %c0_i32_0, %c0_i32_1 : i32, i32, i32
  }
  func.func @transform_6(%arg0: i32) -> (i32, i32) {
    %c0_i32 = arith.constant 0 : i32
    %c0_i32_0 = arith.constant 0 : i32
    %c0_i32_1 = arith.constant 0 : i32
    return %c0_i32, %c0_i32_0 : i32, i32
  }
  func.func @transform_7(%arg0: i32) -> (i32, i32) {
    %c0_i32 = arith.constant 0 : i32
    %c0_i32_0 = arith.constant 0 : i32
    %c0_i32_1 = arith.constant 0 : i32
    return %c0_i32, %c0_i32_0 : i32, i32
  }
  func.func @transform_8(%arg0: i32) -> (i32, i32) {
    %c0_i32 = arith.constant 0 : i32
    %c0_i32_0 = arith.constant 0 : i32
    %c0_i32_1 = arith.constant 0 : i32
    return %c0_i32, %c0_i32_0 : i32, i32
  }
  func.func @transform_9(%arg0: i32) -> (i32, i32, i32) {
    %c0_i32 = arith.constant 0 : i32
    %c0_i32_0 = arith.constant 0 : i32
    %c0_i32_1 = arith.constant 0 : i32
    %c0_i32_2 = arith.constant 0 : i32
    return %c0_i32, %c0_i32_0, %c0_i32_1 : i32, i32, i32
  }
  func.func @transform_10(%arg0: i32) -> (i32, i32) {
    %c0_i32 = arith.constant 0 : i32
    %c0_i32_0 = arith.constant 0 : i32
    %c0_i32_1 = arith.constant 0 : i32
    return %c0_i32, %c0_i32_0 : i32, i32
  }
  func.func @transform_11(%arg0: i32) -> (i32, i32) {
    %c0_i32 = arith.constant 0 : i32
    %c0_i32_0 = arith.constant 0 : i32
    %c0_i32_1 = arith.constant 0 : i32
    return %c0_i32, %c0_i32_0 : i32, i32
  }
  func.func @transform_12(%arg0: i32) -> (i32, i32) {
    %c0_i32 = arith.constant 0 : i32
    %c0_i32_0 = arith.constant 0 : i32
    %c0_i32_1 = arith.constant 0 : i32
    return %c0_i32, %c0_i32_0 : i32, i32
  }
  func.func @transform_13(%arg0: i32) -> (i32, i32, i32) {
    %c0_i32 = arith.constant 0 : i32
    %c0_i32_0 = arith.constant 0 : i32
    %c0_i32_1 = arith.constant 0 : i32
    return %arg0, %c0_i32, %c0_i32_0 : i32, i32, i32
  }
}

</mosaic_0001>

<bundles_post_ra>
// kernel: cnn_forward.1
= control target key start
LH: loop header
LB: loop body
LE: loop exit
PB: predicated region body
PF: predicated region fallthrough
CT: control target
= control target key end

     0   :  { %s1964_s25 = smov 0   ;;  %s2585_s0 = inlined_call_operand.vmem [shape: f32[4,4,256], index: 0, kind: input, shape index: {}]   ;;  %s2586_s1 = inlined_call_operand.vmem [shape: f32[3,8,12], index: 1, kind: input, shape index: {}]   ;;  %s2587_s2 = inlined_call_operand.vmem [shape: f32[8,1], index: 2, kind: input, shape index: {}]   ;;  %s2588_s3 = inlined_call_operand.vmem [shape: f32[3,256], index: 3, kind: input, shape index: {}]   ;;  %s2589_s4 = inlined_call_operand.vmem [shape: f32[256,64], index: 4, kind: input, shape index: {}]   ;;  %s2590_s5 = inlined_call_operand.vmem [shape: f32[3,8,24], index: 5, kind: input, shape index: {}]   ;;  %s2591_s6 = inlined_call_operand.vmem [shape: f32[8,1], index: 6, kind: input, shape index: {}]   ;;  %s2592_s7 = inlined_call_operand.vmem [shape: f32[3,64], index: 7, kind: input, shape index: {}]   ;;  %s2593_s8 = inlined_call_operand.vmem [shape: f32[64,16], index: 8, kind: input, shape index: {}]   ;;  %s2594_s9 = inlined_call_operand.vmem [shape: f32[3,8,24], index: 9, kind: input, shape index: {}]   ;;  %s2595_s10 = inlined_call_operand.vmem [shape: f32[8,1], index: 10, kind: input, shape index: {}]   ;;  %s2596_s11 = inlined_call_operand.vmem [shape: f32[3,16], index: 11, kind: input, shape index: {}]   ;;  %s2597_s12 = inlined_call_operand.vmem [shape: f32[16,4], index: 12, kind: input, shape index: {}]   ;;  %s2598_s13 = inlined_call_operand.vmem [shape: f32[4,8,4], index: 13, kind: output, shape index: {}]  }
   0x1 LB: > { %s1740_s26 = sadd.s32 4294967295, %s1883_s25   ;;  %p1744_p0 = scmp.ge.s32.totalorder %s1883_s25, 1  ;;  %s1883_s25 = sphi %s1964_s25, %s23_s25  }
   0x2   : > { %p389_p1 = scmp.lt.s32.totalorder %s1883_s25, 3 }
   0x4   : > { %p390_p2 = pnand %p1744_p0, %p389_p1 }
   0x5   : > { %s1745_s27 = sshll.u32 (!%p390_p2), %s1740_s26, 1  ;;  %s1885_s15 = smov (!%p390_p2), 1  }
   0x6   : > { %393 = sbr.rel (%p390_p2) target bundleno = 2612 (0xa34), region = 72  ;;  %p435_p3 = scmp.lt.s32.totalorder (!%p390_p2), %s1745_s27, 3 }
   0x7   : > { %s1886_s16 = smov (!%p390_p2), 127   ;;  %s1887_s19 = smov (!%p390_p2), 16  }
   0x8   : > { %s1888_s20 = smov (!%p390_p2), 112   ;;  %s1891_s17 = smov (!%p390_p2), 120  }
   0x9   : > { %s1892_s26 = smov (!%p390_p2), 4   ;;  %s1893_s29 = smov (!%p390_p2), 124  }
   0xb   : > { %s2606_s27 = smov (!%p435_p3, %s1745_s27), 3  ;;  %v454_v10 = vld [vmem:[%s2588_s3] sm:$0x77]  ;;  %vm495_vm0 = vcmask 7168   ;;  %vm535_vm1 = vcmask 1043456   ;;  %vm516_vm2 = vcmask 1039360  }
   0xc   : > { %s1836_s28 = sshll.u32 %s2606_s27, 3  ;;  %v501_v11 = vperm.slane %v454_v10, 0  ;;  %v502_v16 = vperm.slane %v454_v10, 4  ;;  %v521_v23 = vperm.slane %v454_v10, 2  ;;  %v522_v24 = vperm.slane %v454_v10, 6  ;;  %v2024_v33 = vld [vmem:[%s2586_s1 + $0x8] sm:$0xff] }
   0xd   : > { %s439_s14 = scalar_lea.vmem %s2585_s0, %s1836_s28  ;;  %vm558_vm3 = vcmask 97280   ;;  %vm550_vm4 = vcmask 130048   ;;  %v453_v34 = vld [vmem:[%s2587_s2] sm:$0xff]  ;;  %v1889_v35 = vmov 0   ;;  %vm662_vm6 = vcmask 916480   ;;  %v2063_v52 = vld [vmem:[%s2586_s1 + $0x10] sm:$0xff] }
   0xe   : > { %v447_v0 = vld [vmem:[%s439_s14] sm:$0xff]  ;;  %v1984_v6 = vld [vmem:[%s439_s14 + $0x8] sm:$0xff]  ;;  %v1993_v12 = vperm.slane %v501_v11, 0  ;;  %v1999_v18 = vperm.slane %v502_v16, 0  ;;  %v2005_v26 = vperm.slane %v521_v23, 2  ;;  %v2007_v27 = vperm.slane %v522_v24, 2  ;;  %1854 = vset.pattern.permute.xlu0 %v1889_v35  ;;  %1875 = vset.pattern.permute.xlu2 %v1889_v35  ;;  %vm2036_vm5 = vmneg %vm550_vm4 }
   0xf   : > { %488 = vst [vmem:[#allocation1] ss:$2 sm:$0xff] %v447_v0  ;;  %1876 = vset.pattern.permute.xlu1 %v1889_v35  ;;  %v2043_v40 = vld [vmem:[%s2586_s1] sm:$0xff]  ;;  %v2083_v10 = vld [vmem:[%s2589_s4 + $0x78] sm:$0xff]  ;;  %v2110_v16 = vld [vmem:[%s2589_s4 + $0xe8] sm:$0xff]  ;;  %s1890_s14 = smov 8  }
  0x10   : > { %v2088_v11 = vld [vmem:[%s2589_s4 + $0xf8] sm:$0xff]  ;;  %vm1097_vm11 = vcmask 515072   ;;  %vm1116_vm12 = vcmask 195584   ;;  %vm1112_vm13 = vcmask 64512   ;;  %vm1172_vm15 = vcmask 457728  }
  0x11   : > { %vm2399_vm14 = vmneg %vm1112_vm13 }
  0x16   : > { %v489_v1 = vld.sshfl [vmem:[#allocation1] sm:$0xff pattern:$0x75316420]  ;;  %v490_v2 = vld.sshfl [vmem:[#allocation1 + $0x8] sm:$0xff pattern:$0x75316420] }
  0x17   : > { %491 = vrot.lane.b32.xlu1 %v489_v1, %s1885_s15  ;;  %509 = vst [vmem:[#allocation1] ss:$2 sm:$0xff] %v447_v0 }
  0x1e   : > { %v510_v3 = vld.sshfl [vmem:[#allocation1] sm:$0xff pattern:$0x75316420]  ;;  %v511_v4 = vld.sshfl [vmem:[#allocation1 + $0x8] sm:$0xff pattern:$0x75316420] }
  0x1f   : > { %493 = vrot.lane.b32.xlu1 %v490_v2, %s1885_s15  ;;  %512 = vrot.lane.b32.xlu0 %v510_v3, %s1886_s16  ;;  %530 = vst [vmem:[#allocation1 + $0x1] ss:$2 sm:$0xff] %v447_v0 }
  0x26   : > { %v531_v5 = vld.sshfl [vmem:[#allocation1] sm:$0xff pattern:$0x75316420]  ;;  %v532_v7 = vld.sshfl [vmem:[#allocation1 + $0x8] sm:$0xff pattern:$0x75316420] }
  0x27   : > { %514 = vrot.lane.b32.xlu0 %v511_v4, %s1886_s16  ;;  %798 = vst [vmem:[#allocation1] ss:$2 sm:$0xff] %v1984_v6 }
  0x2e   : > { %v1987_v8 = vld.sshfl [vmem:[#allocation1] sm:$0xff pattern:$0x75316420]  ;;  %v800_v9 = vld.sshfl [vmem:[#allocation1 + $0x8] sm:$0xff pattern:$0x75316420] }
  0x2f   : > { %811 = vst [vmem:[#allocation1] ss:$2 sm:$0xff] %v1984_v6 }
  0x36   : > { %v813_v53 = vld.sshfl [vmem:[#allocation1 + $0x8] sm:$0xff pattern:$0x75316420]  ;;  %v812_v54 = vld.sshfl [vmem:[#allocation1] sm:$0xff pattern:$0x75316420] }
  0x37   : > { %825 = vst [vmem:[#allocation1 + $0x1] ss:$2 sm:$0xff] %v1984_v6 }
  0x89   : > { %v492_v13 = vpop.permute.xlu1 %491 }
  0x8a   : > { %v499_v14 = vsel %vm495_vm0, 0.0, %v492_v13 }
  0x8b   : > { %v507_v15 = vmul.f32 %v1993_v12, %v499_v14  ;;  %v2100_v14 = vld [vmem:[%s2589_s4 + $0xf0] sm:$0xff] }
  0x8d   : > { %v536_v17 = vsel %vm535_vm1, %v507_v15, %v531_v5  ;;  %v2105_v15 = vld [vmem:[%s2589_s4 + $0x68] sm:$0xff] }
  0x8e   : > { %542 = vrot.lane.b32.xlu0 %v536_v17, %s1887_s19 }
  0x91   : > { %v494_v19 = vpop.permute.xlu1 %493  ;;  %v513_v20 = vpop.permute.xlu0 %512 }
  0x92   : > { %v496_v21 = vsel %vm495_vm0, %v492_v13, %v494_v19  ;;  %v2093_v13 = vld [vmem:[%s2589_s4 + $0x70] sm:$0xff] }
  0x93   : > { %v508_v22 = vmul.f32 %v1999_v18, %v496_v21 }
  0x95   : > { %v537_v25 = vsel %vm535_vm1, %v508_v22, %v532_v7 }
  0x96   : > { %544 = vrot.lane.b32.xlu1 %v537_v25, %s1887_s19 }
  0x99   : > { %v515_v28 = vpop.permute.xlu0 %514 }
  0x9a   : > { %v517_v29 = vsel %vm516_vm2, %v513_v20, %v515_v28  ;;  %v520_v30 = vsel %vm516_vm2, %v515_v28, 0.0 }
  0x9b   : > { %v527_v31 = vmul.f32 %v2005_v26, %v517_v29  ;;  %v528_v32 = vmul.f32 %v2007_v27, %v520_v30 }
  0x9d   : > { %1753 = vmatpush.msk.msra.mxu1 %vm535_vm1, %v528_v32  ;;  %546 = vrot.lane.b32.xlu2 %v527_v31, %s1887_s19 }
  0x9e   : > { %1751 = vmatpush.msk.msra.mxu0 %vm535_vm1, %v527_v31  ;;  %660 = vrot.lane.b32.xlu0 %v528_v32, %s1888_s20 }
  0x9f   : > { %654 = vrot.lane.b32.xlu1 %v536_v17, %s1888_s20  ;;  %601 = vmatpush.msra.mxu1 %v537_v25 }
  0xa0   : > { %581 = vmatpush.msra.mxu0 %v536_v17  ;;  %1754 = vmatmul.msk.f32.vlgmr.msra.gmra.mxu1 %vm558_vm3, %v2024_v33 }
  0xa1   : > { %1752 = vmatmul.msk.f32.vlgmr.msra.gmra.mxu0 %vm558_vm3, %v2024_v33 }
  0xa5   : > { %548 = vrot.lane.b32.xlu2 %v528_v32, %s1887_s19 }
  0xa6   : > { %722 = vperm.xlu0 %1854, %v453_v34  }
  0xad   : > { %658 = vrot.lane.b32.xlu2 %v527_v31, %s1888_s20 }
  0xae   : > { %803 = vrot.lane.b32.xlu0 %v800_v9, %s1885_s15 }
  0xb5   : > { %656 = vrot.lane.b32.xlu2 %v537_v25, %s1888_s20 }
  0xbd   : > { %814 = vrot.lane.b32.xlu2 %v812_v54, %s1886_s16  ;;  %v2222_v54 = vld [vmem:[%s2589_s4 + $0x30] sm:$0xff] }
  0xc5   : > { %801 = vrot.lane.b32.xlu2 %v1987_v8, %s1885_s15 }
  0xf7   : > { %v547_v36 = vpop.permute.xlu2 %546 }
  0xf8   : > { %v557_v37 = vsel %vm550_vm4, 0.0, %v547_v36 }
  0xf9   : > { %1755 = vmatpush.msk.msra.mxu2 %vm535_vm1, %v557_v37 }
  0xff   : > { %v549_v39 = vpop.permute.xlu2 %548 }
 0x100   : > { %v552_v41 = vsel %vm550_vm4, %v547_v36, %v549_v39  ;;  %v543_v42 = vpop.permute.xlu0 %542  ;;  %v827_v39 = vld.sshfl [vmem:[#allocation1 + $0x8] sm:$0xff pattern:$0x75316420] }
 0x101   : > { %1759 = vmatpush.msk.msra.mxu3 %vm535_vm1, %v552_v41  ;;  %1757 = vmatpush.msk.msra.mxu2 %vm2036_vm5, %v543_v42 }
 0x102   : > { %1758 = vmatmul.msk.f32.vlgmr.msra.gmra.mxu2 %vm558_vm3, %v2043_v40 }
 0x103   : > { %757 = vmatpush.msrb.mxu2 %v2083_v10 }
 0x105   : > { %758 = vmatpush.msrb.mxu2 %v2093_v13 }
 0x107   : > { %v659_v43 = vpop.permute.xlu2 %658  ;;  %759 = vmatpush.msrb.mxu2 %v2105_v15 }
 0x108   : > { %v545_v44 = vpop.permute.xlu1 %544 }
 0x109   : > { %v551_v45 = vsel %vm550_vm4, %v543_v42, %v545_v44 }
 0x10a   : > { %649 = vmatpush.msra.mxu3 %v551_v45  ;;  %v2174_v45 = vld [vmem:[%s2589_s4 + $0x50] sm:$0xff] }
 0x10b   : > { %1760 = vmatmul.msk.f32.vlgmr.msra.gmra.mxu3 %vm558_vm3, %v2043_v40 }
 0x10c   : > { %777 = vmatpush.msrb.mxu3 %v2088_v11 }
 0x10e   : > { %778 = vmatpush.msrb.mxu3 %v2100_v14 }
 0x10f   : > { %v657_v46 = vpop.permute.xlu2 %656 }
 0x110   : > { %v661_v47 = vpop.permute.xlu0 %660  ;;  %779 = vmatpush.msrb.mxu3 %v2110_v16 }
 0x111   : > { %v655_v48 = vpop.permute.xlu1 %654  ;;  %v664_v49 = vsel %vm662_vm6, %v659_v43, %v661_v47  ;;  %v669_v50 = vsel %vm662_vm6, %v661_v47, 0.0  ;;  %v826_v43 = vld.sshfl [vmem:[#allocation1] sm:$0xff pattern:$0x75316420]  ;;  %v2186_v47 = vld [vmem:[%s2589_s4 + $0x48] sm:$0xff] }
 0x112   : > { %1761 = vmatpush.msk.msrb.mxu0 %vm535_vm1, %v664_v49  ;;  %1763 = vmatpush.msk.msrb.mxu1 %vm535_vm1, %v669_v50  ;;  %v663_v51 = vsel %vm662_vm6, %v655_v48, %v657_v46  ;;  %v2191_v48 = vld [vmem:[%s2589_s4 + $0xc8] sm:$0xff]  ;;  %v2200_v49 = vld [vmem:[%s2589_s4 + $0x40] sm:$0xff] }
 0x113   : > { %v2205_v50 = vld [vmem:[%s2589_s4 + $0xc0] sm:$0xff] }
 0x114   : > { %693 = vmatpush.msrb.mxu0 %v663_v51  ;;  %1764 = vmatpush.msk.msrb.mxu1 %vm662_vm6, %v657_v46  ;;  %v2179_v46 = vld [vmem:[%s2589_s4 + $0xd0] sm:$0xff]  ;;  %v2210_v51 = vld [vmem:[%s2589_s4 + $0x38] sm:$0xff] }
 0x115   : > { %1762 = vmatmul.msk.f32.vlgmr.msrb.gmra.mxu0 %vm558_vm3, %v2063_v52  ;;  %1765 = vmatmul.msk.f32.vlgmr.msrb.gmra.mxu1 %vm558_vm3, %v2063_v52 }
 0x117   : > { %v815_v9 = vpop.permute.xlu2 %814 }
 0x118   : > { %v2074_v61 = vpop.permute.xlu0 %722 }
 0x11d   : > { %v603_v56 = vpop.f32.mrf.mxu1 }
 0x11e   : > { %v583_v55 = vpop.f32.mrf.mxu0 }
 0x11f   : > { %v802_v24 = vpop.permute.xlu2 %801 }
 0x120   : > { %v804_v21 = vpop.permute.xlu0 %803  ;;  %v808_v31 = vsel %vm495_vm0, 0.0, %v802_v24 }
 0x121   : > { %v805_v29 = vsel %vm495_vm0, %v802_v24, %v804_v21  ;;  %v809_v37 = vmul.f32 %v808_v31, %v1993_v12  ;;  %v2152_v12 = vld [vmem:[%s2589_s4 + $0x60] sm:$0xff] }
 0x122   : > { %v810_v34 = vmul.f32 %v805_v29, %v1999_v18  ;;  %760 = vmatpush.msrb.mxu2 %v2152_v12 }
 0x123   : > { %v830_v18 = vsel %vm535_vm1, %v809_v37, %v826_v43 }
 0x124   : > { %v831_v44 = vsel %vm535_vm1, %v810_v34, %v827_v39 }
 0x185   : > { %v631_v57 = vpop.f32.mrf.mxu2 }
 0x186   : > { %v632_v60 = vadd.f32 %v631_v57, %v583_v55  ;;  %v2227_v55 = vld [vmem:[%s2589_s4 + $0xb0] sm:$0xff]  ;;  %v2239_v57 = vld [vmem:[%s2589_s4 + $0xa8] sm:$0xff] }
 0x18e   : > { %v651_v58 = vpop.f32.mrf.mxu3 }
 0x18f   : > { %v652_v59 = vadd.f32 %v651_v58, %v603_v56  ;;  %v2234_v56 = vld [vmem:[%s2589_s4 + $0x28] sm:$0xff]  ;;  %v2248_v58 = vld [vmem:[%s2589_s4 + $0x20] sm:$0xff] }
 0x192   : > { %v695_v62 = vpop.f32.mrf.mxu0  ;;  %v715_v63 = vpop.f32.mrf.mxu1 }
 0x193   : > { %v718_v0 = vadd.f32 %v695_v62, %v632_v60  ;;  %v719_v1 = vadd.f32 %v715_v63, %v652_v59  ;;  %v2253_v59 = vld [vmem:[%s2589_s4 + $0xa0] sm:$0xff]  ;;  %v2258_v60 = vld [vmem:[%s2589_s4 + $0x18] sm:$0xff]  ;;  %v2272_v63 = vld [vmem:[%s2589_s4 + $0x10] sm:$0xff] }
 0x194   : > { %v2263_v62 = vld [vmem:[%s2589_s4 + $0x98] sm:$0xff] }
 0x195   : > { %v725_v2 = vadd.f32 %v2074_v61, %v718_v0  ;;  %v726_v3 = vadd.f32 %v2074_v61, %v719_v1  ;;  %v2277_v0 = vld [vmem:[%s2589_s4 + $0x90] sm:$0xff]  ;;  %v2284_v1 = vld [vmem:[%s2589_s4 + $0x8] sm:$0xff] }
 0x197   : > { %vm727_vm7 = vcmp.ge.f32.partialorder %v725_v2, 0.0  ;;  %vm728_vm8 = vcmp.ge.f32.partialorder %v726_v3, 0.0  ;;  %v729_v4 = vmul.f32 0.01, %v725_v2  ;;  %v730_v5 = vmul.f32 0.01, %v726_v3 }
 0x199   : > { %v731_v6 = vsel %vm727_vm7, %v725_v2, %v729_v4  ;;  %v732_v7 = vsel %vm728_vm8, %v726_v3, %v730_v5  ;;  %v2289_v2 = vld [vmem:[%s2589_s4 + $0x88] sm:$0xff]  ;;  %v2296_v3 = vld [vmem:[%s2589_s4] sm:$0xff]  ;;  %vm1414_vm7 = vcmask 31744  }
 0x19a   : > { %v1855_v8 = vpack.i.bf16 %v732_v7, %v731_v6  ;;  %v2301_v4 = vld [vmem:[%s2589_s4 + $0x80] sm:$0xff]  ;;  %vm2504_vm8 = vmneg %vm1414_vm7 }
 0x19c   : > { %1856 = vrot.lane.b32.xlu1 %v1855_v8, %s1886_s16 }
 0x1a4   : > { %816 = vrot.lane.b32.xlu1 %v813_v53, %s1886_s16  ;;  %v2215_v53 = vld [vmem:[%s2589_s4 + $0xb8] sm:$0xff] }
 0x20e   : > { %v1857_v17 = vpop.permute.xlu1 %1856 }
 0x20f   : > { %v1859_v19 = vunpack.i.h.bf16 %v1857_v17  ;;  %v1858_v20 = vunpack.i.l.bf16 %v1857_v17 }
 0x211   : > { %v742_v22 = vsel %vm516_vm2, %v1859_v19, 0.0  ;;  %v739_v23 = vsel %vm516_vm2, %v1858_v20, %v1859_v19 }
 0x212   : > { %v2118_v25 = vmax.f32 %v732_v7, %v742_v22  ;;  %v2120_v28 = vmax.f32 %v731_v6, %v739_v23 }
 0x214   : > { %v1860_v30 = vpack.i.bf16 %v2118_v25, %v2120_v28 }
 0x216   : > { %v817_v32 = vpop.permute.xlu1 %816  ;;  %1861 = vrot.lane.b32.xlu1 %v1860_v30, %s1888_s20 }
 0x217   : > { %v818_v35 = vsel %vm516_vm2, %v815_v9, %v817_v32  ;;  %v821_v36 = vsel %vm516_vm2, %v817_v32, 0.0 }
 0x218   : > { %v822_v41 = vmul.f32 %v818_v35, %v2005_v26  ;;  %v823_v42 = vmul.f32 %v821_v36, %v2007_v27  ;;  %v2157_v26 = vld [vmem:[%s2589_s4 + $0xe0] sm:$0xff]  ;;  %v2164_v27 = vld [vmem:[%s2589_s4 + $0x58] sm:$0xff] }
 0x219   : > { %780 = vmatpush.msrb.mxu3 %v2157_v26  ;;  %761 = vmatpush.msrb.mxu2 %v2164_v27 }
 0x21a   : > { %842 = vrot.lane.b32.xlu0 %v823_v42, %s1887_s19  ;;  %840 = vrot.lane.b32.xlu2 %v822_v41, %s1887_s19 }
 0x21b   : > { %1766 = vmatpush.msk.msra.mxu0 %vm535_vm1, %v822_v41  ;;  %1768 = vmatpush.msk.msra.mxu1 %vm535_vm1, %v823_v42 }
 0x21c   : > { %762 = vmatpush.msrb.mxu2 %v2174_v45 }
 0x21d   : > { %870 = vmatpush.msra.mxu0 %v830_v18  ;;  %890 = vmatpush.msra.mxu1 %v831_v44 }
 0x21e   : > { %836 = vrot.lane.b32.xlu1 %v830_v18, %s1887_s19  ;;  %1767 = vmatmul.msk.f32.vlgmr.msra.gmra.mxu0 %vm558_vm3, %v2024_v33 }
 0x21f   : > { %1769 = vmatmul.msk.f32.vlgmr.msra.gmra.mxu1 %vm558_vm3, %v2024_v33  ;;  %v2169_v33 = vld [vmem:[%s2589_s4 + $0xd8] sm:$0xff]  ;;  %763 = vmatpush.msrb.mxu2 %v2186_v47 }
 0x220   : > { %781 = vmatpush.msrb.mxu3 %v2169_v33 }
 0x221   : > { %764 = vmatpush.msrb.mxu2 %v2200_v49 }
 0x222   : > { %944 = vrot.lane.b32.xlu0 %v822_v41, %s1888_s20  ;;  %838 = vrot.lane.b32.xlu2 %v831_v44, %s1887_s19 }
 0x223   : > { %782 = vmatpush.msrb.mxu3 %v2179_v46  ;;  %765 = vmatpush.msrb.mxu2 %v2210_v51 }
 0x225   : > { %783 = vmatpush.msrb.mxu3 %v2191_v48  ;;  %766 = vmatpush.msrb.mxu2 %v2222_v54 }
 0x226   : > { %946 = vrot.lane.b32.xlu1 %v823_v42, %s1888_s20 }
 0x227   : > { %784 = vmatpush.msrb.mxu3 %v2205_v50  ;;  %767 = vmatpush.msrb.mxu2 %v2234_v56 }
 0x229   : > { %785 = vmatpush.msrb.mxu3 %v2215_v53  ;;  %768 = vmatpush.msrb.mxu2 %v2248_v58 }
 0x22a   : > { %942 = vrot.lane.b32.xlu0 %v831_v44, %s1888_s20  ;;  %940 = vrot.lane.b32.xlu2 %v830_v18, %s1888_s20 }
 0x22b   : > { %786 = vmatpush.msrb.mxu3 %v2227_v55  ;;  %769 = vmatpush.msrb.mxu2 %v2258_v60 }
 0x22d   : > { %787 = vmatpush.msrb.mxu3 %v2239_v57  ;;  %770 = vmatpush.msrb.mxu2 %v2272_v63 }
 0x22f   : > { %788 = vmatpush.msrb.mxu3 %v2253_v59  ;;  %771 = vmatpush.msrb.mxu2 %v2284_v1 }
 0x231   : > { %789 = vmatpush.msrb.mxu3 %v2263_v62  ;;  %772 = vmatpush.msrb.mxu2 %v2296_v3 }
 0x233   : > { %790 = vmatpush.msrb.mxu3 %v2277_v0 }
 0x235   : > { %791 = vmatpush.msrb.mxu3 %v2289_v2 }
 0x237   : > { %792 = vmatpush.msrb.mxu3 %v2301_v4 }
 0x274   : > { %v841_v5 = vpop.permute.xlu2 %840 }
 0x275   : > { %v850_v6 = vsel %vm550_vm4, 0.0, %v841_v5 }
 0x276   : > { %1770 = vmatpush.msk.msrb.mxu0 %vm535_vm1, %v850_v6  ;;  %v2412_v6 = vld [vmem:[%s2590_s5] sm:$0xff] }
 0x27c   : > { %v839_v24 = vpop.permute.xlu2 %838 }
 0x284   : > { %v941_v34 = vpop.permute.xlu2 %940 }
 0x288   : > { %v1862_v7 = vpop.permute.xlu1 %1861 }
 0x289   : > { %v1864_v8 = vunpack.i.h.bf16 %v1862_v7  ;;  %v1863_v9 = vunpack.i.l.bf16 %v1862_v7  ;;  %v2417_v7 = vld [vmem:[%s2590_s5 + $0x10] sm:$0xff] }
 0x28b   : > { %v754_v17 = vsel %vm662_vm6, %v1864_v8, 0.0  ;;  %v751_v19 = vsel %vm662_vm6, %v1863_v9, %v1864_v8 }
 0x28c   : > { %v843_v20 = vpop.permute.xlu0 %842  ;;  %v755_v21 = vmax.f32 %v2120_v28, %v751_v19  ;;  %v756_v22 = vmax.f32 %v2118_v25, %v754_v17 }
 0x28d   : > { %v845_v23 = vsel %vm550_vm4, %v841_v5, %v843_v20 }
 0x28e   : > { %773 = vmatmul.f32.vlgmr.msrb.gmra.mxu2 %v755_v21  ;;  %793 = vmatmul.f32.vlgmr.msrb.gmra.mxu3 %v756_v22 }
 0x28f   : > { %1774 = vmatpush.msk.msrb.mxu1 %vm535_vm1, %v845_v23 }
 0x290   : > { %v837_v29 = vpop.permute.xlu1 %836 }
 0x291   : > { %v844_v30 = vsel %vm550_vm4, %v837_v29, %v839_v24  ;;  %1772 = vmatpush.msk.msrb.mxu0 %vm2036_vm5, %v837_v29 }
 0x292   : > { %935 = vmatpush.msrb.mxu1 %v844_v30  ;;  %1773 = vmatmul.msk.f32.vlgmr.msrb.gmra.mxu0 %vm558_vm3, %v2043_v40 }
 0x293   : > { %1775 = vmatmul.msk.f32.vlgmr.msrb.gmra.mxu1 %vm558_vm3, %v2043_v40 }
 0x294   : > { %v945_v25 = vpop.permute.xlu0 %944 }
 0x298   : > { %v947_v28 = vpop.permute.xlu1 %946 }
 0x299   : > { %v949_v31 = vsel %vm662_vm6, %v945_v25, %v947_v28  ;;  %v954_v32 = vsel %vm662_vm6, %v947_v28, 0.0 }
 0x29a   : > { %1776 = vmatpush.msk.msra.mxu0 %vm535_vm1, %v949_v31  ;;  %1778 = vmatpush.msk.msra.mxu1 %vm535_vm1, %v954_v32 }
 0x29c   : > { %v943_v38 = vpop.permute.xlu0 %942  ;;  %v892_v40 = vpop.f32.mrf.mxu1 }
 0x29d   : > { %1779 = vmatpush.msk.msra.mxu1 %vm662_vm6, %v943_v38  ;;  %v948_v35 = vsel %vm662_vm6, %v941_v34, %v943_v38 }
 0x29e   : > { %975 = vmatpush.msra.mxu0 %v948_v35  ;;  %1780 = vmatmul.msk.f32.vlgmr.msra.gmra.mxu1 %vm558_vm3, %v2063_v52 }
 0x29f   : > { %1777 = vmatmul.msk.f32.vlgmr.msra.gmra.mxu0 %vm558_vm3, %v2063_v52  ;;  %1054 = vmatpush.msrb.mxu1 %v2088_v11  ;;  %v872_v52 = vpop.f32.mrf.mxu0 }
 0x2a0   : > { %1034 = vmatpush.msrb.mxu0 %v2083_v10 }
 0x2a1   : > { %1055 = vmatpush.msrb.mxu1 %v2100_v14 }
 0x2a2   : > { %1035 = vmatpush.msrb.mxu0 %v2093_v13 }
 0x2a3   : > { %1056 = vmatpush.msrb.mxu1 %v2110_v16 }
 0x2a4   : > { %1036 = vmatpush.msrb.mxu0 %v2105_v15 }
 0x2a5   : > { %1057 = vmatpush.msrb.mxu1 %v2157_v26 }
 0x2a6   : > { %1037 = vmatpush.msrb.mxu0 %v2152_v12 }
 0x2a7   : > { %1058 = vmatpush.msrb.mxu1 %v2169_v33 }
 0x2a8   : > { %1038 = vmatpush.msrb.mxu0 %v2164_v27 }
 0x2a9   : > { %1059 = vmatpush.msrb.mxu1 %v2179_v46 }
 0x2aa   : > { %1039 = vmatpush.msrb.mxu0 %v2174_v45  ;;  %v2372_v45 = vld [vmem:[%s2592_s7] sm:$0x7] }
 0x2ab   : > { %1060 = vmatpush.msrb.mxu1 %v2191_v48 }
 0x2ac   : > { %1040 = vmatpush.msrb.mxu0 %v2186_v47 }
 0x2ad   : > { %1061 = vmatpush.msrb.mxu1 %v2205_v50  ;;  %v1092_v50 = vperm.slane %v2372_v45, 0 }
 0x2ae   : > { %1041 = vmatpush.msrb.mxu0 %v2200_v49 }
 0x2af   : > { %1062 = vmatpush.msrb.mxu1 %v2215_v53 }
 0x2b0   : > { %1042 = vmatpush.msrb.mxu0 %v2210_v51 }
 0x2b1   : > { %1063 = vmatpush.msrb.mxu1 %v2227_v55 }
 0x2b2   : > { %1043 = vmatpush.msrb.mxu0 %v2222_v54 }
 0x2b3   : > { %1064 = vmatpush.msrb.mxu1 %v2239_v57 }
 0x2b4   : > { %1044 = vmatpush.msrb.mxu0 %v2234_v56 }
 0x2b5   : > { %1065 = vmatpush.msrb.mxu1 %v2253_v59 }
 0x2b6   : > { %1045 = vmatpush.msrb.mxu0 %v2248_v58 }
 0x2b7   : > { %1066 = vmatpush.msrb.mxu1 %v2263_v62 }
 0x2b8   : > { %1046 = vmatpush.msrb.mxu0 %v2258_v60 }
 0x2b9   : > { %1067 = vmatpush.msrb.mxu1 %v2277_v0 }
 0x2ba   : > { %1047 = vmatpush.msrb.mxu0 %v2272_v63  ;;  %v2392_v63 = vld [vmem:[%s2590_s5 + $0x8] sm:$0xff] }
 0x2bb   : > { %1068 = vmatpush.msrb.mxu1 %v2289_v2 }
 0x2bc   : > { %1048 = vmatpush.msrb.mxu0 %v2284_v1  ;;  %v1077_v1 = vld [vmem:[%s2591_s6] sm:$0xff] }
 0x2bd   : > { %1069 = vmatpush.msrb.mxu1 %v2301_v4 }
 0x2be   : > { %1049 = vmatpush.msrb.mxu0 %v2296_v3 }
 0x30f   : > { %v917_v15 = vpop.f32.mrf.mxu0 }
 0x310   : > { %v937_v14 = vpop.f32.mrf.mxu1  ;;  %v918_v36 = vadd.f32 %v917_v15, %v872_v52  ;;  %v1083_v15 = vld [vmem:[%s2593_s8 + $0x20] sm:$0xff] }
 0x311   : > { %v774_v10 = vpop.f32.mrf.mxu2  ;;  %v794_v11 = vpop.f32.mrf.mxu3  ;;  %v938_v16 = vadd.f32 %v937_v14, %v892_v40  ;;  %v1084_v14 = vld [vmem:[%s2593_s8 + $0x28] sm:$0xff] }
 0x312   : > { %v795_v13 = vadd.f32 %v794_v11, %v774_v10  ;;  %v1086_v11 = vld [vmem:[%s2593_s8 + $0x38] sm:$0xff] }
 0x313   : > { %1370 = vmatpush.msra.mxu0 %v1086_v11 }
 0x314   : > { %1088 = vrot.lane.b32.xlu2 %v795_v13, %s1885_s15  ;;  %1094 = vrot.lane.b32.xlu1 %v795_v13, %s1886_s16 }
 0x31b   : > { %v997_v37 = vpop.f32.mrf.mxu1 }
 0x31c   : > { %v1001_v39 = vadd.f32 %v997_v37, %v938_v16  ;;  %v977_v41 = vpop.f32.mrf.mxu0  ;;  %1105 = vrot.lane.b32.xlu2 %v795_v13, %s1890_s14  ;;  %v1082_v16 = vld [vmem:[%s2593_s8 + $0x18] sm:$0xff] }
 0x31d   : > { %v1000_v42 = vadd.f32 %v977_v41, %v918_v36  ;;  %v1081_v36 = vld [vmem:[%s2593_s8 + $0x10] sm:$0xff] }
 0x31e   : > { %v1003_v43 = vadd.f32 %v1001_v39, %v2074_v61 }
 0x31f   : > { %v1002_v44 = vadd.f32 %v1000_v42, %v2074_v61  ;;  %v1099_v61 = vperm.slane %v2372_v45, 2 }
 0x320   : > { %vm1005_vm9 = vcmp.ge.f32.partialorder %v1003_v43, 0.0  ;;  %v1007_v18 = vmul.f32 0.01, %v1003_v43 }
 0x321   : > { %vm1004_vm10 = vcmp.ge.f32.partialorder %v1002_v44, 0.0  ;;  %v1006_v12 = vmul.f32 0.01, %v1002_v44 }
 0x322   : > { %v1009_v26 = vsel %vm1005_vm9, %v1003_v43, %v1007_v18 }
 0x323   : > { %v1008_v27 = vsel %vm1004_vm10, %v1002_v44, %v1006_v12 }
 0x324   : > { %1165 = vrot.lane.b32.xlu2 %v795_v13, %s1891_s17  ;;  %v1865_v33 = vpack.i.bf16 %v1009_v26, %v1008_v27 }
 0x326   : > { %1866 = vrot.lane.b32.xlu0 %v1865_v33, %s1886_s16  ;;  %v1079_v33 = vld [vmem:[%s2593_s8] sm:$0xff] }
 0x32c   : > { %1202 = vperm.xlu2 %1875, %v1077_v1  }
 0x36e   : > { %v1089_v47 = vpop.permute.xlu2 %1088 }
 0x36f   : > { %v1091_v51 = vsel %vm495_vm0, 0.0, %v1089_v47 }
 0x370   : > { %v1093_v53 = vmul.f32 %v1092_v50, %v1091_v51 }
 0x376   : > { %v1106_v0 = vpop.permute.xlu2 %1105 }
 0x37e   : > { %v1166_v5 = vpop.permute.xlu2 %1165 }
 0x386   : > { %v1095_v46 = vpop.permute.xlu1 %1094  ;;  %v2428_v31 = vpop.permute.xlu2 %1202 }
 0x387   : > { %v1098_v48 = vsel %vm1097_vm11, %v1095_v46, 0.0 }
 0x388   : > { %v1100_v49 = vmul.f32 %v1099_v61, %v1098_v48 }
 0x38a   : > { %1167 = vrot.lane.b32.xlu0 %v1100_v49, %s1891_s17  ;;  %1107 = vrot.lane.b32.xlu1 %v1100_v49, %s1890_s14 }
 0x38b   : > { %1133 = vmatpush.msra.mxu2 %v1100_v49 }
 0x38d   : > { %1134 = vmatpush.msra.mxu2 %v795_v13  ;;  %v1085_v13 = vld [vmem:[%s2593_s8 + $0x30] sm:$0xff] }
 0x38e   : > { %1371 = vmatpush.msra.mxu0 %v1085_v13 }
 0x38f   : > { %1135 = vmatpush.msra.mxu2 %v1093_v53 }
 0x390   : > { %1781 = vmatmul.msk.f32.vlgmr.msra.gmra.mxu2 %vm1116_vm12, %v2392_v63  ;;  %1372 = vmatpush.msra.mxu0 %v1084_v14 }
 0x392   : > { %1163 = vrot.lane.b32.xlu0 %v1093_v53, %s1891_s17  ;;  %1103 = vrot.lane.b32.xlu1 %v1093_v53, %s1890_s14 }
 0x393   : > { %1373 = vmatpush.msra.mxu0 %v1083_v15 }
 0x395   : > { %1374 = vmatpush.msra.mxu0 %v1082_v16 }
 0x397   : > { %1375 = vmatpush.msra.mxu0 %v1081_v36 }
 0x398   : > { %v1867_v54 = vpop.permute.xlu0 %1866 }
 0x399   : > { %v1869_v55 = vunpack.i.h.bf16 %v1867_v54  ;;  %v1868_v56 = vunpack.i.l.bf16 %v1867_v54 }
 0x39b   : > { %v1019_v57 = vsel %vm516_vm2, %v1869_v55, 0.0  ;;  %v1016_v58 = vsel %vm516_vm2, %v1868_v56, %v1869_v55  ;;  %vm1221_vm2 = vcmask 523264  }
 0x39c   : > { %v1021_v59 = vmax.f32 %v1009_v26, %v1019_v57  ;;  %v1020_v60 = vmax.f32 %v1008_v27, %v1016_v58  ;;  %v1080_v27 = vld [vmem:[%s2593_s8 + $0x8] sm:$0xff] }
 0x39d   : > { %1376 = vmatpush.msra.mxu0 %v1080_v27 }
 0x39e   : > { %v1870_v62 = vpack.i.bf16 %v1021_v59, %v1020_v60 }
 0x39f   : > { %1377 = vmatpush.msra.mxu0 %v1079_v33 }
 0x3a0   : > { %1871 = vrot.lane.b32.xlu1 %v1870_v62, %s1888_s20 }
 0x3fc   : > { %v1168_v3 = vpop.permute.xlu0 %1167  ;;  %v1108_v4 = vpop.permute.xlu1 %1107 }
 0x3fd   : > { %1783 = vmatpush.msk.msra.mxu3 %vm2399_vm14, %v1108_v4  ;;  %1789 = vmatpush.msk.msrb.mxu2 %vm1172_vm15, %v1168_v3 }
 0x3ff   : > { %1785 = vmatpush.msk.msra.mxu3 %vm2399_vm14, %v1106_v0  ;;  %1790 = vmatpush.msk.msrb.mxu2 %vm1172_vm15, %v1166_v5  ;;  %v1386_v0 = vld [vmem:[%s2596_s11] sm:$0x7] }
 0x400   : > { %v1401_v1 = vperm.slane %v1386_v0, 2 }
 0x404   : > { %v1164_v8 = vpop.permute.xlu0 %1163  ;;  %v1104_v9 = vpop.permute.xlu1 %1103 }
 0x405   : > { %1787 = vmatpush.msk.msra.mxu3 %vm2399_vm14, %v1104_v9  ;;  %1791 = vmatpush.msk.msrb.mxu2 %vm1172_vm15, %v1164_v8  ;;  %v1394_v8 = vperm.slane %v1386_v0, 0 }
 0x406   : > { %1788 = vmatmul.msk.f32.vlgmr.msra.gmra.mxu3 %vm1116_vm12, %v2412_v6  ;;  %1792 = vmatmul.msk.f32.vlgmr.msrb.gmra.mxu2 %vm1116_vm12, %v2417_v7 }
 0x407   : > { %1233 = vmatpush.msrb.mxu3 %v1086_v11 }
 0x409   : > { %1234 = vmatpush.msrb.mxu3 %v1085_v13  ;;  %v1382_v13 = vld [vmem:[%s2594_s9] sm:$0xff] }
 0x40b   : > { %1235 = vmatpush.msrb.mxu3 %v1084_v14  ;;  %v1384_v14 = vld [vmem:[%s2594_s9 + $0x10] sm:$0xff] }
 0x40d   : > { %1236 = vmatpush.msrb.mxu3 %v1083_v15 }
 0x40f   : > { %1237 = vmatpush.msrb.mxu3 %v1082_v16 }
 0x411   : > { %1238 = vmatpush.msrb.mxu3 %v1081_v36 }
 0x412   : > { %v1872_v17 = vpop.permute.xlu1 %1871 }
 0x413   : > { %v1874_v19 = vunpack.i.h.bf16 %v1872_v17  ;;  %v1873_v20 = vunpack.i.l.bf16 %v1872_v17  ;;  %v1137_v29 = vpop.f32.mrf.mxu2  ;;  %1239 = vmatpush.msrb.mxu3 %v1080_v27 }
 0x415   : > { %v1031_v21 = vsel %vm662_vm6, %v1874_v19, 0.0  ;;  %v1028_v22 = vsel %vm662_vm6, %v1873_v20, %v1874_v19  ;;  %1240 = vmatpush.msrb.mxu3 %v1079_v33  ;;  %vm1399_vm6 = vcmask 121856  }
 0x416   : > { %v1033_v23 = vmax.f32 %v1021_v59, %v1031_v21  ;;  %v1032_v24 = vmax.f32 %v1020_v60, %v1028_v22 }
 0x418   : > { %1050 = vmatmul.f32.vlgmr.msrb.gmra.mxu0 %v1032_v24  ;;  %1070 = vmatmul.f32.vlgmr.msrb.gmra.mxu1 %v1033_v23 }
 0x489   : > { %v1160_v30 = vpop.f32.mrf.mxu3  ;;  %v1196_v25 = vpop.f32.mrf.mxu2 }
 0x48a   : > { %v1161_v28 = vadd.f32 %v1160_v30, %v1137_v29 }
 0x48c   : > { %v1199_v32 = vadd.f32 %v1196_v25, %v1161_v28 }
 0x48e   : > { %v1205_v34 = vadd.f32 %v2428_v31, %v1199_v32 }
 0x490   : > { %vm1206_vm1 = vcmp.ge.f32.partialorder %v1205_v34, 0.0  ;;  %v1207_v38 = vmul.f32 0.01, %v1205_v34 }
 0x492   : > { %v1208_v35 = vsel %vm1206_vm1, %v1205_v34, %v1207_v38  ;;  %v1383_v34 = vld [vmem:[%s2594_s9 + $0x8] sm:$0xff]  ;;  %v1385_v38 = vld [vmem:[%s2595_s10] sm:$0xff] }
 0x493   : > { %1210 = vrot.lane.b32.xlu0 %v1208_v35, %s1886_s16 }
 0x495   : > { %v1051_v40 = vpop.f32.mrf.mxu0  ;;  %v1071_v52 = vpop.f32.mrf.mxu1 }
 0x496   : > { %v1072_v10 = vadd.f32 %v1071_v52, %v1051_v40 }
 0x498   : > { %1246 = vrot.lane.b32.xlu2 %v1072_v10, %s1885_s15  ;;  %1251 = vrot.lane.b32.xlu1 %v1072_v10, %s1886_s16 }
 0x4a0   : > { %1260 = vrot.lane.b32.xlu2 %v1072_v10, %s1890_s14 }
 0x4a8   : > { %1312 = vrot.lane.b32.xlu2 %v1072_v10, %s1891_s17 }
 0x4f2   : > { %v1247_v42 = vpop.permute.xlu2 %1246 }
 0x4f3   : > { %v1249_v12 = vsel %vm495_vm0, 0.0, %v1247_v42 }
 0x4f4   : > { %v1250_v26 = vmul.f32 %v1249_v12, %v1092_v50 }
 0x4fa   : > { %v1261_v45 = vpop.permute.xlu2 %1260 }
 0x502   : > { %v1313_v50 = vpop.permute.xlu2 %1312 }
 0x505   : > { %v1211_v37 = vpop.permute.xlu0 %1210 }
 0x506   : > { %v1213_v39 = vsel %vm1097_vm11, %v1211_v37, 0.0 }
 0x507   : > { %v1214_v41 = vmax.f32 %v1208_v35, %v1213_v39 }
 0x509   : > { %1216 = vrot.lane.b32.xlu0 %v1214_v41, %s1891_s17 }
 0x50a   : > { %v1252_v43 = vpop.permute.xlu1 %1251 }
 0x50b   : > { %v1254_v44 = vsel %vm1097_vm11, %v1252_v43, 0.0 }
 0x50c   : > { %v1255_v18 = vmul.f32 %v1254_v44, %v1099_v61 }
 0x50e   : > { %1262 = vrot.lane.b32.xlu1 %v1255_v18, %s1890_s14  ;;  %1283 = vmatpush.msra.mxu2 %v1255_v18 }
 0x510   : > { %1284 = vmatpush.msra.mxu2 %v1072_v10 }
 0x511   : > { %1314 = vrot.lane.b32.xlu0 %v1255_v18, %s1891_s17 }
 0x512   : > { %1285 = vmatpush.msra.mxu2 %v1250_v26 }
 0x513   : > { %1794 = vmatmul.msk.f32.vlgmr.msra.gmra.mxu2 %vm1116_vm12, %v2392_v63 }
 0x516   : > { %1258 = vrot.lane.b32.xlu1 %v1250_v26, %s1890_s14 }
 0x519   : > { %1310 = vrot.lane.b32.xlu0 %v1250_v26, %s1891_s17 }
 0x57b   : > { %v1217_v61 = vpop.permute.xlu0 %1216 }
 0x57c   : > { %v1219_v46 = vsel %vm1172_vm15, %v1217_v61, 0.0 }
 0x57d   : > { %v1220_v47 = vmax.f32 %v1214_v41, %v1219_v46 }
 0x57f   : > { %1793 = vmatmul.msk.f32.vlgmr.msrb.gmra.mxu3 %vm1221_vm2, %v1220_v47 }
 0x580   : > { %v1263_v48 = vpop.permute.xlu1 %1262 }
 0x581   : > { %1796 = vmatpush.msk.msrb.mxu2 %vm2399_vm14, %v1263_v48 }
 0x583   : > { %1798 = vmatpush.msk.msrb.mxu2 %vm2399_vm14, %v1261_v45  ;;  %v1315_v49 = vpop.permute.xlu0 %1314 }
 0x584   : > { %1802 = vmatpush.msk.msra.mxu3 %vm1172_vm15, %v1315_v49 }
 0x586   : > { %1803 = vmatpush.msk.msra.mxu3 %vm1172_vm15, %v1313_v50 }
 0x588   : > { %v1259_v51 = vpop.permute.xlu1 %1258 }
 0x589   : > { %1800 = vmatpush.msk.msrb.mxu2 %vm2399_vm14, %v1259_v51 }
 0x58a   : > { %1801 = vmatmul.msk.f32.vlgmr.msrb.gmra.mxu2 %vm1116_vm12, %v2412_v6 }
 0x58b   : > { %v1311_v53 = vpop.permute.xlu0 %1310 }
 0x58c   : > { %1804 = vmatpush.msk.msra.mxu3 %vm1172_vm15, %v1311_v53 }
 0x58d   : > { %1805 = vmatmul.msk.f32.vlgmr.msra.gmra.mxu3 %vm1116_vm12, %v2417_v7 }
 0x596   : > { %v1287_v55 = vpop.f32.mrf.mxu2 }
 0x602   : > { %v1242_v54 = vpop.f32.mrf.mxu3 }
 0x603   : > { %1396 = vrot.lane.b32.xlu0 %v1242_v54, %s1886_s16 }
 0x60d   : > { %v1307_v56 = vpop.f32.mrf.mxu2 }
 0x60e   : > { %v1308_v57 = vadd.f32 %v1307_v56, %v1287_v55 }
 0x610   : > { %v1339_v58 = vpop.f32.mrf.mxu3 }
 0x611   : > { %v1342_v59 = vadd.f32 %v1339_v58, %v1308_v57  ;;  %v1388_v58 = vld [vmem:[%s2597_s12 + $0x8] sm:$0xff] }
 0x613   : > { %v1343_v60 = vadd.f32 %v1342_v59, %v2428_v31  ;;  %v1387_v59 = vld [vmem:[%s2597_s12] sm:$0xff] }
 0x615   : > { %vm1344_vm5 = vcmp.ge.f32.partialorder %v1343_v60, 0.0  ;;  %v1345_v62 = vmul.f32 0.01, %v1343_v60 }
 0x617   : > { %v1346_v63 = vsel %vm1344_vm5, %v1343_v60, %v1345_v62 }
 0x618   : > { %1348 = vrot.lane.b32.xlu1 %v1346_v63, %s1886_s16 }
 0x620   : > { %1390 = vrot.lane.b32.xlu1 %v1242_v54, %s1885_s15 }
 0x675   : > { %v1397_v2 = vpop.permute.xlu0 %1396 }
 0x676   : > { %v1400_v3 = vsel %vm1399_vm6, %v1397_v2, 0.0 }
 0x677   : > { %v1402_v4 = vmul.f32 %v1401_v1, %v1400_v3 }
 0x679   : > { %1409 = vrot.lane.b32.xlu1 %v1402_v4, %s1892_s26  ;;  %1434 = vmatpush.msra.mxu1 %v1402_v4 }
 0x67b   : > { %1435 = vmatpush.msra.mxu1 %v1242_v54 }
 0x681   : > { %1466 = vrot.lane.b32.xlu1 %v1242_v54, %s1893_s29 }
 0x68a   : > { %v1349_v5 = vpop.permute.xlu1 %1348 }
 0x68b   : > { %v1351_v6 = vsel %vm1097_vm11, %v1349_v5, 0.0 }
 0x68c   : > { %v1352_v7 = vmax.f32 %v1346_v63, %v1351_v6 }
 0x68e   : > { %1354 = vrot.lane.b32.xlu2 %v1352_v7, %s1891_s17  ;;  %s445_s17 = scalar_lea.vmem %s2598_s13, %s1836_s28 }
 0x692   : > { %v1391_v9 = vpop.permute.xlu1 %1390 }
 0x693   : > { %v1393_v17 = vsel %vm495_vm0, 0.0, %v1391_v9 }
 0x694   : > { %v1395_v19 = vmul.f32 %v1394_v8, %v1393_v17 }
 0x696   : > { %1436 = vmatpush.msra.mxu1 %v1395_v19 }
 0x697   : > { %1807 = vmatmul.msk.f32.vlgmr.msra.gmra.mxu1 %vm1116_vm12, %v1383_v34 }
 0x698   : > { %1538 = vmatpush.msrb.mxu1 %v1388_v58 }
 0x69a   : > { %1539 = vmatpush.msrb.mxu1 %v1387_v59 }
 0x69c   : > { %1675 = vmatpush.msra.mxu1 %v1388_v58 }
 0x69e   : > { %1676 = vmatpush.msra.mxu1 %v1387_v59 }
 0x6e8   : > { %v1355_v20 = vpop.permute.xlu2 %1354 }
 0x6e9   : > { %v1357_v21 = vsel %vm1172_vm15, %v1355_v20, 0.0 }
 0x6ea   : > { %v1358_v23 = vmax.f32 %v1352_v7, %v1357_v21 }
 0x6eb   : > { %v1410_v24 = vpop.permute.xlu1 %1409 }
 0x6ec   : > { %1806 = vmatmul.msk.f32.vlgmr.msra.gmra.mxu0 %vm1221_vm2, %v1358_v23  ;;  %1809 = vmatpush.msk.msra.mxu2 %vm2504_vm8, %v1410_v24 }
 0x6f3   : > { %v1467_v32 = vpop.permute.xlu1 %1466 }
 0x714   : > { %v1438_v43 = vpop.f32.mrf.mxu1 }
 0x769   : > { %v1379_v29 = vpop.f32.mrf.mxu0 }
 0x76a   : > { %1545 = vrot.lane.b32.xlu0 %v1379_v29, %s1885_s15  ;;  %1550 = vrot.lane.b32.xlu2 %v1379_v29, %s1886_s16 }
 0x772   : > { %1407 = vrot.lane.b32.xlu0 %v1242_v54, %s1892_s26  ;;  %1468 = vrot.lane.b32.xlu2 %v1402_v4, %s1893_s29 }
 0x77a   : > { %1464 = vrot.lane.b32.xlu0 %v1395_v19, %s1893_s29  ;;  %1405 = vrot.lane.b32.xlu2 %v1395_v19, %s1892_s26 }
 0x782   : > { %1559 = vrot.lane.b32.xlu2 %v1379_v29, %s1892_s26 }
 0x78a   : > { %1611 = vrot.lane.b32.xlu2 %v1379_v29, %s1893_s29 }
 0x7c4   : > { %v1551_v30 = vpop.permute.xlu2 %1550 }
 0x7c5   : > { %v1553_v25 = vsel %vm1399_vm6, %v1551_v30, 0.0 }
 0x7c6   : > { %v1554_v28 = vmul.f32 %v1553_v25, %v1401_v1 }
 0x7c8   : > { %1561 = vrot.lane.b32.xlu1 %v1554_v28, %s1892_s26 }
 0x7cc   : > { %v1469_v31 = vpop.permute.xlu2 %1468 }
 0x7cd   : > { %1815 = vmatpush.msk.msrb.mxu3 %vm558_vm3, %v1469_v31 }
 0x7cf   : > { %1816 = vmatpush.msk.msrb.mxu3 %vm558_vm3, %v1467_v32 }
 0x7d0   : > { %1613 = vrot.lane.b32.xlu1 %v1554_v28, %s1893_s29 }
 0x7d4   : > { %v1406_v11 = vpop.permute.xlu2 %1405 }
 0x7d8   : > { %1502 = vperm.xlu1 %1876, %v1385_v38  }
 0x7dc   : > { %v1546_v35 = vpop.permute.xlu0 %1545  ;;  %v1560_v16 = vpop.permute.xlu2 %1559 }
 0x7dd   : > { %v1548_v40 = vsel %vm495_vm0, 0.0, %v1546_v35 }
 0x7de   : > { %v1549_v52 = vmul.f32 %v1548_v40, %v1394_v8 }
 0x7e0   : > { %1557 = vrot.lane.b32.xlu0 %v1549_v52, %s1892_s26 }
 0x7e4   : > { %v1408_v10 = vpop.permute.xlu0 %1407  ;;  %v1612_v39 = vpop.permute.xlu2 %1611 }
 0x7e5   : > { %1811 = vmatpush.msk.msra.mxu2 %vm2504_vm8, %v1408_v10 }
 0x7e7   : > { %1813 = vmatpush.msk.msra.mxu2 %vm2504_vm8, %v1406_v11 }
 0x7e8   : > { %1609 = vrot.lane.b32.xlu0 %v1549_v52, %s1893_s29  ;;  %1814 = vmatmul.msk.f32.vlgmr.msra.gmra.mxu2 %vm1116_vm12, %v1382_v13 }
 0x7e9   : > { %1582 = vmatpush.msrb.mxu2 %v1554_v28 }
 0x7eb   : > { %1583 = vmatpush.msrb.mxu2 %v1379_v29 }
 0x7ec   : > { %v1465_v15 = vpop.permute.xlu0 %1464 }
 0x7ed   : > { %1584 = vmatpush.msrb.mxu2 %v1549_v52  ;;  %1817 = vmatpush.msk.msrb.mxu3 %vm558_vm3, %v1465_v15 }
 0x7ee   : > { %1818 = vmatmul.msk.f32.vlgmr.msrb.gmra.mxu3 %vm1116_vm12, %v1384_v14 }
 0x7f0   : > { %1820 = vmatmul.msk.f32.vlgmr.msrb.gmra.mxu2 %vm1116_vm12, %v1383_v34 }
 0x83a   : > { %v1562_v36 = vpop.permute.xlu1 %1561 }
 0x83b   : > { %1822 = vmatpush.msk.msra.mxu3 %vm2504_vm8, %v1562_v36 }
 0x83d   : > { %1824 = vmatpush.msk.msra.mxu3 %vm2504_vm8, %v1560_v16 }
 0x842   : > { %v1614_v37 = vpop.permute.xlu1 %1613 }
 0x843   : > { %1828 = vmatpush.msk.msrb.mxu0 %vm558_vm3, %v1614_v37 }
 0x845   : > { %1829 = vmatpush.msk.msrb.mxu0 %vm558_vm3, %v1612_v39 }
 0x84a   : > { %v1503_v26 = vpop.permute.xlu1 %1502 }
 0x852   : > { %v1558_v41 = vpop.permute.xlu0 %1557 }
 0x853   : > { %1826 = vmatpush.msk.msra.mxu3 %vm2504_vm8, %v1558_v41 }
 0x854   : > { %1827 = vmatmul.msk.f32.vlgmr.msra.gmra.mxu3 %vm1116_vm12, %v1382_v13 }
 0x85a   : > { %v1610_v42 = vpop.permute.xlu0 %1609 }
 0x85b   : > { %1830 = vmatpush.msk.msrb.mxu0 %vm558_vm3, %v1610_v42 }
 0x85c   : > { %1831 = vmatmul.msk.f32.vlgmr.msrb.gmra.mxu0 %vm1116_vm12, %v1384_v14 }
 0x86b   : > { %v1461_v44 = vpop.f32.mrf.mxu2 }
 0x86c   : > { %v1462_v18 = vadd.f32 %v1461_v44, %v1438_v43 }
 0x871   : > { %v1496_v12 = vpop.f32.mrf.mxu3 }
 0x872   : > { %v1499_v27 = vadd.f32 %v1496_v12, %v1462_v18 }
 0x873   : > { %v1586_v49 = vpop.f32.mrf.mxu2 }
 0x874   : > { %v1505_v33 = vadd.f32 %v1503_v26, %v1499_v27 }
 0x876   : > { %vm1506_vm0 = vcmp.ge.f32.partialorder %v1505_v33, 0.0  ;;  %v1507_v45 = vmul.f32 0.01, %v1505_v33 }
 0x878   : > { %v1508_v61 = vsel %vm1506_vm0, %v1505_v33, %v1507_v45 }
 0x879   : > { %1510 = vrot.lane.b32.xlu2 %v1508_v61, %s1886_s16 }
 0x8d3   : > { %v1511_v46 = vpop.permute.xlu2 %1510 }
 0x8d4   : > { %v1513_v47 = vsel %vm1399_vm6, %v1511_v46, 0.0 }
 0x8d5   : > { %v1514_v48 = vmax.f32 %v1508_v61, %v1513_v47 }
 0x8d7   : > { %1516 = vrot.lane.b32.xlu1 %v1514_v48, %s1893_s29  ;;  %v1606_v50 = vpop.f32.mrf.mxu3 }
 0x8d8   : > { %v1607_v51 = vadd.f32 %v1606_v50, %v1586_v49 }
 0x8d9   : > { %v1638_v53 = vpop.f32.mrf.mxu0 }
 0x8da   : > { %v1641_v54 = vadd.f32 %v1638_v53, %v1607_v51 }
 0x8dc   : > { %v1642_v55 = vadd.f32 %v1641_v54, %v1503_v26 }
 0x8de   : > { %vm1643_vm9 = vcmp.ge.f32.partialorder %v1642_v55, 0.0  ;;  %v1644_v56 = vmul.f32 0.01, %v1642_v55 }
 0x8e0   : > { %v1645_v57 = vsel %vm1643_vm9, %v1642_v55, %v1644_v56 }
 0x8e1   : > { %1647 = vrot.lane.b32.xlu0 %v1645_v57, %s1886_s16 }
 0x949   : > { %v1517_v60 = vpop.permute.xlu1 %1516 }
 0x94a   : > { %v1519_v62 = vsel %vm558_vm3, %v1517_v60, 0.0 }
 0x94b   : > { %v1520_v63 = vmax.f32 %v1514_v48, %v1519_v62 }
 0x94d   : > { %1819 = vmatmul.msk.f32.vlgmr.msrb.gmra.mxu1 %vm550_vm4, %v1520_v63 }
 0x953   : > { %v1648_v0 = vpop.permute.xlu0 %1647 }
 0x954   : > { %v1650_v1 = vsel %vm1399_vm6, %v1648_v0, 0.0 }
 0x955   : > { %v1651_v2 = vmax.f32 %v1645_v57, %v1650_v1 }
 0x957   : > { %1653 = vrot.lane.b32.xlu2 %v1651_v2, %s1893_s29 }
 0x9b1   : > { %v1654_v3 = vpop.permute.xlu2 %1653 }
 0x9b2   : > { %v1656_v4 = vsel %vm558_vm3, %v1654_v3, 0.0 }
 0x9b3   : > { %v1657_v5 = vmax.f32 %v1651_v2, %v1656_v4 }
 0x9b5   : > { %1832 = vmatmul.msk.f32.vlgmr.msra.gmra.mxu1 %vm550_vm4, %v1657_v5 }
 0x9ca   : > { %v1541_v6 = vpop.f32.mrf.mxu1 }
 0x9cb   : > { %1681 = vst.msk [vmem:[%s445_s17] sm:$0xff] %vm1414_vm7, %v1541_v6 }
 0xa32   : > { %v1678_v7 = vpop.f32.mrf.mxu1 }
 0xa33   : > { %1833 = vst.msk [vmem:[%s445_s17 + $0x8] sm:$0xff] %vm1414_vm7, %v1678_v7 }
 0xa34 PF: > { %s23_s25 = sadd.s32 1, %s1883_s25  }
 0xa35   : > { %p20_p4 = scmp.ge.s32.totalorder %s23_s25, 4  }
 0xa37   :  { %22 = sbr.rel (!%p20_p4) target bundleno = 1 (0x1), region = 106 }

</bundles_post_ra>
